<compile_context>
chip_gen: v7x
topology: tpu7x:2x2x1
jax: 0.10.0
libtpu: 0.0.40
codegen_flags: <defaults>
</compile_context>

<pallas_src>
import functools

import jax
import jax.numpy as jnp
from jax.experimental import pallas as pl
from jax.experimental.pallas import tpu as pltpu


def _luong_decoder_kernel(
    xh_ref,      # VMEM (TB, 2H) bf16  : [embed(prev_y) | h_prev]
    h0_ref,      # VMEM (TB, H)  f32   : previous decoder hidden
    enc_ref,     # VMEM (TB, S, H) bf16: encoder states, batch-major
    w_sum_ref,   # VMEM (2H, 3H) bf16  : [w_ih.T ; w_hh.T] fused GRU weight
    w_hn_ref,    # VMEM (H, H)   bf16  : w_hh_n.T (new-gate hidden weight)
    b_rz_ref,    # VMEM (1, 2H)  f32   : b_ih[:2H] + b_hh[:2H]
    b_in_ref,    # VMEM (1, H)   f32   : b_ih[2H:]
    b_hn_ref,    # VMEM (1, H)   f32   : b_hh[2H:]
    w_cls_ref,   # VMEM (2H, TY) bf16  : classifier weight tile (streamed over Y)
    b_cls_ref,   # VMEM (1, TY)  f32   : classifier bias tile
    logp_ref,    # VMEM (TB, Y)  f32   out: log-probs (resident across Y tiles)
    h_new_ref,   # VMEM (TB, H)  f32   out: new hidden
    attw_ref,    # VMEM (TB, S)  f32   out: attention weights
    ctx_s,       # VMEM (TB, H)  bf16  scratch: attention context
    hnew_s,      # VMEM (TB, H)  bf16  scratch: new hidden (bf16 copy for MXU)
    m_s,         # VMEM (TB, 1)  f32   scratch: running max of logits
    s_s,         # VMEM (TB, 1)  f32   scratch: running sum of exp(logits - m)
):
    H = h0_ref.shape[-1]
    ty = w_cls_ref.shape[-1]
    j = pl.program_id(1)
    nj = pl.num_programs(1)

    # ---- GRU step + Luong attention: only on the first vocab tile of each batch block ----
    @pl.when(j == 0)
    def _gru_and_attention():
        h_prev = h0_ref[...]                                           # (TB, H) f32

        # fused GRU matmuls: gsum = x @ w_ih.T + h @ w_hh.T ; ghn = h @ w_hh_n.T
        gsum = jnp.dot(xh_ref[...], w_sum_ref[...],
                       preferred_element_type=jnp.float32)             # (TB, 3H)
        ghn = jnp.dot(h_prev.astype(jnp.bfloat16), w_hn_ref[...],
                      preferred_element_type=jnp.float32)              # (TB, H)

        # PyTorch gate layout [reset | update | new].  (Gate slices are lane-aligned when
        # H is a multiple of 128, which the demo uses.)
        rz = jax.nn.sigmoid(gsum[:, :2 * H] + b_rz_ref[...])
        r = rz[:, :H]
        z = rz[:, H:]
        gin = gsum[:, 2 * H:] - ghn                                    # = x @ w_ih_n.T
        n = jnp.tanh(gin + b_in_ref[...] + r * (ghn + b_hn_ref[...]))
        h_new = (1.0 - z) * n + z * h_prev                             # (TB, H) f32

        # Luong dot attention, batch-major MXU contractions (flash-style, q == 1).
        enc = enc_ref[...]                                             # (TB, S, H) bf16
        hq = h_new.astype(jnp.bfloat16)[:, None, :]                    # (TB, 1, H)
        s3 = jnp.einsum("bqh,bsh->bqs", hq, enc,
                        preferred_element_type=jnp.float32)            # (TB, 1, S)
        mmax = jnp.max(s3, axis=-1, keepdims=True)
        e = jnp.exp(s3 - mmax)
        denom = jnp.sum(e, axis=-1, keepdims=True)
        w3 = e * pl.reciprocal(denom, approx=True)                     # (TB, 1, S) f32
        ctx3 = jnp.einsum("bqs,bsh->bqh", w3.astype(jnp.bfloat16), enc,
                          preferred_element_type=jnp.float32)          # (TB, 1, H)

        h_new_ref[...] = h_new
        attw_ref[...] = w3[:, 0, :]
        ctx_s[...] = ctx3[:, 0, :].astype(jnp.bfloat16)
        hnew_s[...] = h_new.astype(jnp.bfloat16)
        m_s[...] = jnp.full_like(m_s, -jnp.inf)
        s_s[...] = jnp.zeros_like(s_s)

    # ---- classifier tile: logits = [ctx ; h_new] @ w_cls_tile + b_tile (no concat) ----
    logits = (jnp.dot(ctx_s[...], w_cls_ref[:H, :], preferred_element_type=jnp.float32)
              + jnp.dot(hnew_s[...], w_cls_ref[H:, :], preferred_element_type=jnp.float32)
              + b_cls_ref[...])                                        # (TB, TY) f32

    col = pl.multiple_of(j * ty, ty)
    logp_ref[:, pl.ds(col, ty)] = logits                               # raw logits for now

    # online logsumexp over the vocab tiles
    tile_max = jnp.max(logits, axis=-1, keepdims=True)
    m_new = jnp.maximum(m_s[...], tile_max)
    s_s[...] = (s_s[...] * jnp.exp(m_s[...] - m_new)
                + jnp.sum(jnp.exp(logits - m_new), axis=-1, keepdims=True))
    m_s[...] = m_new

    # ---- finalize: logp = logits - logsumexp, on the resident (TB, Y) block ----
    @pl.when(j == nj - 1)
    def _finalize():
        lse = m_s[...] + jnp.log(s_s[...])
        logp_ref[...] = logp_ref[...] - lse


@functools.partial(jax.jit, static_argnames=("tile_y", "tile_b"))
def luong_decoder_forward(prev_y_hat, dec_h, enc_hs, params, *, tile_y=None, tile_b=None):
    """prev_y_hat: (1, B) int; dec_h: (1, B, H) f32; enc_hs: (S, B, H) f32."""
    _, B = prev_y_hat.shape
    S, _, H = enc_hs.shape
    Y = params["embed"].shape[0]

    if tile_b is None:
        tile_b = 8 if B % 8 == 0 else B
    if tile_y is None:
        tile_y = min(Y, 512)
    assert B % tile_b == 0, "batch must be divisible by tile_b"
    assert Y % tile_y == 0, "vocab must be divisible by tile_y"

    bf16 = jnp.bfloat16

    # Embedding gather stays in XLA (only B rows are needed; the table never enters VMEM).
    idx = prev_y_hat[0].astype(jnp.int32)                              # (B,)
    x = jnp.take(params["embed"], idx, axis=0)                         # (B, H)
    h0 = dec_h[0].astype(jnp.float32)                                  # (B, H)
    xh = jnp.concatenate([x, h0], axis=-1).astype(bf16)                # (B, 2H)
    enc = jnp.transpose(enc_hs, (1, 0, 2)).astype(bf16)                # (B, S, H) batch-major

    # Fused GRU weights / biases (PyTorch layout: rows [r | z | n]).
    w_ih_t = params["w_ih"].T                                          # (H, 3H)
    w_hh_t = params["w_hh"].T                                          # (H, 3H)
    w_sum = jnp.concatenate([w_ih_t, w_hh_t], axis=0).astype(bf16)     # (2H, 3H)
    w_hn = w_hh_t[:, 2 * H:].astype(bf16)                              # (H, H)
    b_rz = (params["b_ih"][:2 * H] + params["b_hh"][:2 * H]).reshape(1, -1).astype(jnp.float32)
    b_in = params["b_ih"][2 * H:].reshape(1, -1).astype(jnp.float32)
    b_hn = params["b_hh"][2 * H:].reshape(1, -1).astype(jnp.float32)

    w_cls_t = params["w_cls"].T.astype(bf16)                           # (2H, Y)
    b_cls = params["b_cls"].reshape(1, -1).astype(jnp.float32)         # (1, Y)

    nb, nj = B // tile_b, Y // tile_y

    grid_spec = pltpu.PrefetchScalarGridSpec(
        num_scalar_prefetch=0,
        grid=(nb, nj),
        in_specs=[
            pl.BlockSpec((tile_b, 2 * H), lambda b, j: (b, 0)),        # xh
            pl.BlockSpec((tile_b, H), lambda b, j: (b, 0)),            # h0
            pl.BlockSpec((tile_b, S, H), lambda b, j: (b, 0, 0)),      # enc (batch-major)
            pl.BlockSpec((2 * H, 3 * H), lambda b, j: (0, 0)),         # w_sum
            pl.BlockSpec((H, H), lambda b, j: (0, 0)),                 # w_hn
            pl.BlockSpec((1, 2 * H), lambda b, j: (0, 0)),             # b_rz
            pl.BlockSpec((1, H), lambda b, j: (0, 0)),                 # b_in
            pl.BlockSpec((1, H), lambda b, j: (0, 0)),                 # b_hn
            pl.BlockSpec((2 * H, tile_y), lambda b, j: (0, j)),        # w_cls tile (streamed)
            pl.BlockSpec((1, tile_y), lambda b, j: (0, j)),            # b_cls tile
        ],
        out_specs=(
            pl.BlockSpec((tile_b, Y), lambda b, j: (b, 0)),            # logp (resident over j)
            pl.BlockSpec((tile_b, H), lambda b, j: (b, 0)),            # h_new
            pl.BlockSpec((tile_b, S), lambda b, j: (b, 0)),            # attw
        ),
        scratch_shapes=[
            pltpu.VMEM((tile_b, H), jnp.bfloat16),                     # ctx
            pltpu.VMEM((tile_b, H), jnp.bfloat16),                     # h_new (bf16)
            pltpu.VMEM((tile_b, 1), jnp.float32),                      # running max
            pltpu.VMEM((tile_b, 1), jnp.float32),                      # running sum
        ],
    )

    logp, h_new, attw = pl.pallas_call(
        _luong_decoder_kernel,
        out_shape=(
            jax.ShapeDtypeStruct((B, Y), jnp.float32),
            jax.ShapeDtypeStruct((B, H), jnp.float32),
            jax.ShapeDtypeStruct((B, S), jnp.float32),
        ),
        grid_spec=grid_spec,
        compiler_params=pltpu.CompilerParams(
            # batch axis -> both TensorCores (v7x); vocab axis carries the online lse state.
            dimension_semantics=("parallel", "arbitrary"),
            # sized for v7x's 64 MiB physical / 32 MiB scoped-default VMEM; TILE_Y keeps
            # double-buffered classifier tiles well under this on all generations.
            vmem_limit_bytes=32 * 1024 * 1024,
        ),
    )(xh, h0, enc, w_sum, w_hn, b_rz, b_in, b_hn, w_cls_t, b_cls)

    # TODO(synk): tile enc over S (currently the whole (TB, S, H) block is VMEM-resident),
    # only needed for very long source sequences.

    # restore the torch (seq=1, batch, feat) shapes
    return logp[None, :, :], h_new[None, :, :], attw


def _reference_forward(prev_y_hat, dec_h, enc_hs, params):
    """Pure-JAX mirror of the PyTorch LuongDecoder forward (GRU + dot attention), using the
    same bf16 weight/activation precision with f32 accumulation as the kernel."""
    H = dec_h.shape[-1]
    bf = jnp.bfloat16
    f32 = jnp.float32

    x = params["embed"].astype(bf)[prev_y_hat[0]]                      # (B, H) bf16
    h = dec_h[0].astype(f32)
    hb = h.astype(bf)
    gi = jnp.dot(x, params["w_ih"].T.astype(bf), preferred_element_type=f32) + params["b_ih"]
    gh = jnp.dot(hb, params["w_hh"].T.astype(bf), preferred_element_type=f32) + params["b_hh"]
    r = jax.nn.sigmoid(gi[:, :H] + gh[:, :H])
    z = jax.nn.sigmoid(gi[:, H:2 * H] + gh[:, H:2 * H])
    n = jnp.tanh(gi[:, 2 * H:] + r * gh[:, 2 * H:])
    h_new = (1.0 - z) * n + z * h

    enc = enc_hs.astype(bf)                                            # (S, B, H)
    scores = jnp.einsum("sbh,bh->sb", enc, h_new.astype(bf), preferred_element_type=f32)
    w = jax.nn.softmax(scores, axis=0)                                 # (S, B)
    context = jnp.einsum("sb,sbh->bh", w.astype(bf), enc, preferred_element_type=f32)

    cat = jnp.concatenate([context.astype(bf), h_new.astype(bf)], axis=-1)
    logits = jnp.dot(cat, params["w_cls"].T.astype(bf), preferred_element_type=f32) + params["b_cls"]
    logp = jax.nn.log_softmax(logits, axis=-1)
    return logp[None], h_new[None], w.T


def _init_params(key, y_dim, h_dim):
    ks = jax.random.split(key, 7)
    scale = 0.1
    return {
        "embed": scale * jax.random.normal(ks[0], (y_dim, h_dim), jnp.float32),
        "w_ih": scale * jax.random.normal(ks[1], (3 * h_dim, h_dim), jnp.float32),
        "b_ih": scale * jax.random.normal(ks[2], (3 * h_dim,), jnp.float32),
        "w_hh": scale * jax.random.normal(ks[3], (3 * h_dim, h_dim), jnp.float32),
        "b_hh": scale * jax.random.normal(ks[4], (3 * h_dim,), jnp.float32),
        "w_cls": scale * jax.random.normal(ks[5], (y_dim, 2 * h_dim), jnp.float32),
        "b_cls": scale * jax.random.normal(ks[6], (y_dim,), jnp.float32),
    }


if __name__ == "__main__":
    # small but TPU-friendly shapes: lane-aligned H/S/Y so gate slices and output stores are
    # lane-dense, and Y gives two classifier tiles to exercise the online log-softmax.
    B, H, Y, S = 16, 128, 256, 128

    key = jax.random.PRNGKey(0)
    k_par, k_tok, k_h, k_enc = jax.random.split(key, 4)

    params = _init_params(k_par, Y, H)
    prev_y_hat = jax.random.randint(k_tok, (1, B), 0, Y, dtype=jnp.int32)
    dec_h = 0.1 * jax.random.normal(k_h, (1, B, H), jnp.float32)
    enc_hs = 0.1 * jax.random.normal(k_enc, (S, B, H), jnp.float32)

    logp, h_new, attw = luong_decoder_forward(
        prev_y_hat, dec_h, enc_hs, params, tile_y=128, tile_b=8)
    jax.block_until_ready((logp, h_new, attw))

    ref_logp, ref_h, ref_w = _reference_forward(prev_y_hat, dec_h, enc_hs, params)

    assert jnp.allclose(logp, ref_logp, atol=1e-3, rtol=1e-3), "log-prob mismatch"
    assert jnp.allclose(h_new, ref_h, atol=1e-3, rtol=1e-3), "hidden-state mismatch"
    assert jnp.allclose(attw, ref_w, atol=1e-3, rtol=1e-3), "attention-weight mismatch"

    print("KERNEL_OK")
</pallas_src>

<mosaic_0001>
module attributes {stable_mosaic.version = 11 : i64} {
  func.func @_luong_decoder_kernel(%arg0: i32, %arg1: i32, %arg2: memref<8x256xbf16, #tpu.memory_space<vmem>>, %arg3: memref<8x128xf32, #tpu.memory_space<vmem>>, %arg4: memref<8x128x128xbf16, #tpu.memory_space<vmem>>, %arg5: memref<256x384xbf16, #tpu.memory_space<vmem>>, %arg6: memref<128x128xbf16, #tpu.memory_space<vmem>>, %arg7: memref<1x256xf32, #tpu.memory_space<vmem>>, %arg8: memref<1x128xf32, #tpu.memory_space<vmem>>, %arg9: memref<1x128xf32, #tpu.memory_space<vmem>>, %arg10: memref<256x128xbf16, #tpu.memory_space<vmem>>, %arg11: memref<1x128xf32, #tpu.memory_space<vmem>>, %arg12: memref<8x256xf32, #tpu.memory_space<vmem>>, %arg13: memref<8x128xf32, #tpu.memory_space<vmem>>, %arg14: memref<8x128xf32, #tpu.memory_space<vmem>>, %arg15: memref<8x128xbf16, #tpu.memory_space<vmem>>, %arg16: memref<8x128xbf16, #tpu.memory_space<vmem>>, %arg17: memref<8x1xf32, #tpu.memory_space<vmem>>, %arg18: memref<8x1xf32, #tpu.memory_space<vmem>>) attributes {dimension_semantics = [#tpu.dimension_semantics<parallel>, #tpu.dimension_semantics<arbitrary>], iteration_bounds = array<i64: 2, 2>, scalar_prefetch = 0 : i64, scratch_operands = 4 : i64, tpu.core_type = #tpu.core_type<tc>, window_params = [{transform_indices = @transform_0, window_bounds = array<i64: 8, 256>}, {transform_indices = @transform_1, window_bounds = array<i64: 8, 128>}, {transform_indices = @transform_2, window_bounds = array<i64: 8, 128, 128>}, {pipeline_mode = #tpu.pipeline_mode<synchronous>, transform_indices = @transform_3, window_bounds = array<i64: 256, 384>}, {pipeline_mode = #tpu.pipeline_mode<synchronous>, transform_indices = @transform_4, window_bounds = array<i64: 128, 128>}, {pipeline_mode = #tpu.pipeline_mode<synchronous>, transform_indices = @transform_5, window_bounds = array<i64: 1, 256>}, {pipeline_mode = #tpu.pipeline_mode<synchronous>, transform_indices = @transform_6, window_bounds = array<i64: 1, 128>}, {pipeline_mode = #tpu.pipeline_mode<synchronous>, transform_indices = @transform_7, window_bounds = array<i64: 1, 128>}, {transform_indices = @transform_8, window_bounds = array<i64: 256, 128>}, {transform_indices = @transform_9, window_bounds = array<i64: 1, 128>}, {transform_indices = @transform_10, window_bounds = array<i64: 8, 256>}, {transform_indices = @transform_11, window_bounds = array<i64: 8, 128>}, {transform_indices = @transform_12, window_bounds = array<i64: 8, 128>}]} {
    %c0_i32 = arith.constant 0 : i32
    %0 = arith.cmpi eq, %arg1, %c0_i32 : i32
    %1 = arith.extui %0 : i1 to i32
    %c0_i32_0 = arith.constant 0 : i32
    %2 = arith.cmpi ne, %1, %c0_i32_0 : i32
    scf.if %2 {
      %c0_24 = arith.constant 0 : index
      %c0_25 = arith.constant 0 : index
      %37 = vector.load %arg3[%c0_24, %c0_25] : memref<8x128xf32, #tpu.memory_space<vmem>>, vector<8x128xf32>
      %c0_26 = arith.constant 0 : index
      %c0_27 = arith.constant 0 : index
      %38 = vector.load %arg2[%c0_26, %c0_27] : memref<8x256xbf16, #tpu.memory_space<vmem>>, vector<8x256xbf16>
      %c0_28 = arith.constant 0 : index
      %c0_29 = arith.constant 0 : index
      %39 = vector.load %arg5[%c0_28, %c0_29] : memref<256x384xbf16, #tpu.memory_space<vmem>>, vector<256x384xbf16>
      %cst_30 = arith.constant dense<0.000000e+00> : vector<8x384xf32>
      %40 = tpu.matmul %38, %39, %cst_30 {dimension_numbers = #tpu.dot_dimension_numbers<[1], [0], [0], [1], [0, 0, 1, 1], [], []>} : vector<8x256xbf16>, vector<256x384xbf16>, vector<8x384xf32> -> vector<8x384xf32>
      %41 = arith.truncf %37 : vector<8x128xf32> to vector<8x128xbf16>
      %c0_31 = arith.constant 0 : index
      %c0_32 = arith.constant 0 : index
      %42 = vector.load %arg6[%c0_31, %c0_32] : memref<128x128xbf16, #tpu.memory_space<vmem>>, vector<128x128xbf16>
      %cst_33 = arith.constant dense<0.000000e+00> : vector<8x128xf32>
      %43 = tpu.matmul %41, %42, %cst_33 {dimension_numbers = #tpu.dot_dimension_numbers<[1], [0], [0], [1], [0, 0, 1, 1], [], []>} : vector<8x128xbf16>, vector<128x128xbf16>, vector<8x128xf32> -> vector<8x128xf32>
      %44 = vector.extract_strided_slice %40 {offsets = [0, 0], sizes = [8, 256], strides = [1, 1]} : vector<8x384xf32> to vector<8x256xf32>
      %c0_34 = arith.constant 0 : index
      %c0_35 = arith.constant 0 : index
      %45 = vector.load %arg7[%c0_34, %c0_35] : memref<1x256xf32, #tpu.memory_space<vmem>>, vector<1x256xf32>
      %46 = vector.broadcast %45 : vector<1x256xf32> to vector<8x256xf32>
      %47 = arith.addf %44, %46 : vector<8x256xf32>
      %48 = arith.negf %47 : vector<8x256xf32>
      %49 = math.exp %48 : vector<8x256xf32>
      %cst_36 = arith.constant 1.000000e+00 : f32
      %50 = vector.broadcast %cst_36 : f32 to vector<8x256xf32>
      %51 = arith.addf %50, %49 : vector<8x256xf32>
      %52 = arith.divf %50, %51 : vector<8x256xf32>
      %53 = vector.extract_strided_slice %52 {offsets = [0, 0], sizes = [8, 128], strides = [1, 1]} : vector<8x256xf32> to vector<8x128xf32>
      %54 = vector.extract_strided_slice %52 {offsets = [0, 128], sizes = [8, 128], strides = [1, 1]} : vector<8x256xf32> to vector<8x128xf32>
      %55 = vector.extract_strided_slice %40 {offsets = [0, 256], sizes = [8, 128], strides = [1, 1]} : vector<8x384xf32> to vector<8x128xf32>
      %56 = arith.subf %55, %43 : vector<8x128xf32>
      %c0_37 = arith.constant 0 : index
      %c0_38 = arith.constant 0 : index
      %57 = vector.load %arg8[%c0_37, %c0_38] : memref<1x128xf32, #tpu.memory_space<vmem>>, vector<1x128xf32>
      %58 = vector.broadcast %57 : vector<1x128xf32> to vector<8x128xf32>
      %59 = arith.addf %56, %58 : vector<8x128xf32>
      %c0_39 = arith.constant 0 : index
      %c0_40 = arith.constant 0 : index
      %60 = vector.load %arg9[%c0_39, %c0_40] : memref<1x128xf32, #tpu.memory_space<vmem>>, vector<1x128xf32>
      %61 = vector.broadcast %60 : vector<1x128xf32> to vector<8x128xf32>
      %62 = arith.addf %43, %61 : vector<8x128xf32>
      %63 = arith.mulf %53, %62 : vector<8x128xf32>
      %64 = arith.addf %59, %63 : vector<8x128xf32>
      %65 = math.tanh %64 : vector<8x128xf32>
      %cst_41 = arith.constant 1.000000e+00 : f32
      %66 = vector.broadcast %cst_41 : f32 to vector<8x128xf32>
      %67 = arith.subf %66, %54 : vector<8x128xf32>
      %68 = arith.mulf %67, %65 : vector<8x128xf32>
      %69 = arith.mulf %54, %37 : vector<8x128xf32>
      %70 = arith.addf %68, %69 : vector<8x128xf32>
      %c0_42 = arith.constant 0 : index
      %c0_43 = arith.constant 0 : index
      %c0_44 = arith.constant 0 : index
      %71 = vector.load %arg4[%c0_42, %c0_43, %c0_44] : memref<8x128x128xbf16, #tpu.memory_space<vmem>>, vector<8x128x128xbf16>
      %72 = arith.truncf %70 : vector<8x128xf32> to vector<8x128xbf16>
      %73 = vector.shape_cast %72 : vector<8x128xbf16> to vector<8x1x128xbf16>
      "tpu.trace_start"() <{level = 10 : i32, message = "bqh,bsh->bqs"}> : () -> ()
      %cst_45 = arith.constant dense<0.000000e+00> : vector<8x1x128xf32>
      %74 = tpu.matmul %73, %71, %cst_45 {dimension_numbers = #tpu.dot_dimension_numbers<[2], [2], [1], [1], [0, 0, 0, 1, 1, 1], [0], [0]>} : vector<8x1x128xbf16>, vector<8x128x128xbf16>, vector<8x1x128xf32> -> vector<8x1x128xf32>
      "tpu.trace_stop"() : () -> ()
      %cst_46 = arith.constant dense<0xFF800000> : vector<8x1xf32>
      %75 = vector.multi_reduction <maximumf>, %74, %cst_46 [2] : vector<8x1x128xf32> to vector<8x1xf32>
      %76 = vector.shape_cast %75 : vector<8x1xf32> to vector<8x1x1xf32>
      %77 = vector.broadcast %76 : vector<8x1x1xf32> to vector<8x1x128xf32>
      %78 = arith.subf %74, %77 : vector<8x1x128xf32>
      %79 = math.exp %78 : vector<8x1x128xf32>
      %cst_47 = arith.constant dense<0.000000e+00> : vector<8x1xf32>
      %80 = vector.multi_reduction <add>, %79, %cst_47 [2] : vector<8x1x128xf32> to vector<8x1xf32>
      %81 = vector.shape_cast %80 : vector<8x1xf32> to vector<8x1x1xf32>
      %82 = tpu.reciprocal %81 {approx = true} : vector<8x1x1xf32> -> vector<8x1x1xf32>
      %83 = vector.broadcast %82 : vector<8x1x1xf32> to vector<8x1x128xf32>
      %84 = arith.mulf %79, %83 : vector<8x1x128xf32>
      %85 = arith.truncf %84 : vector<8x1x128xf32> to vector<8x1x128xbf16>
      "tpu.trace_start"() <{level = 10 : i32, message = "bqs,bsh->bqh"}> : () -> ()
      %cst_48 = arith.constant dense<0.000000e+00> : vector<8x1x128xf32>
      %86 = tpu.matmul %85, %71, %cst_48 {dimension_numbers = #tpu.dot_dimension_numbers<[2], [1], [1], [2], [0, 0, 0, 1, 1, 2], [0], [0]>} : vector<8x1x128xbf16>, vector<8x128x128xbf16>, vector<8x1x128xf32> -> vector<8x1x128xf32>
      "tpu.trace_stop"() : () -> ()
      %c0_49 = arith.constant 0 : index
      %c0_50 = arith.constant 0 : index
      %87 = vector.load %arg13[%c0_49, %c0_50] : memref<8x128xf32, #tpu.memory_space<vmem>>, vector<8x128xf32>
      tpu.vector_store %arg13[%c0_49, %c0_50], %70 {strides = array<i32>} : memref<8x128xf32, #tpu.memory_space<vmem>>, vector<8x128xf32>,
      %88 = vector.shape_cast %84 : vector<8x1x128xf32> to vector<8x128xf32>
      %c0_51 = arith.constant 0 : index
      %c0_52 = arith.constant 0 : index
      %89 = vector.load %arg14[%c0_51, %c0_52] : memref<8x128xf32, #tpu.memory_space<vmem>>, vector<8x128xf32>
      tpu.vector_store %arg14[%c0_51, %c0_52], %88 {strides = array<i32>} : memref<8x128xf32, #tpu.memory_space<vmem>>, vector<8x128xf32>,
      %90 = vector.shape_cast %86 : vector<8x1x128xf32> to vector<8x128xf32>
      %91 = arith.truncf %90 : vector<8x128xf32> to vector<8x128xbf16>
      %c0_53 = arith.constant 0 : index
      %c0_54 = arith.constant 0 : index
      %92 = vector.load %arg15[%c0_53, %c0_54] : memref<8x128xbf16, #tpu.memory_space<vmem>>, vector<8x128xbf16>
      tpu.vector_store %arg15[%c0_53, %c0_54], %91 {strides = array<i32>} : memref<8x128xbf16, #tpu.memory_space<vmem>>, vector<8x128xbf16>,
      %93 = arith.truncf %70 : vector<8x128xf32> to vector<8x128xbf16>
      %c0_55 = arith.constant 0 : index
      %c0_56 = arith.constant 0 : index
      %94 = vector.load %arg16[%c0_55, %c0_56] : memref<8x128xbf16, #tpu.memory_space<vmem>>, vector<8x128xbf16>
      tpu.vector_store %arg16[%c0_55, %c0_56], %93 {strides = array<i32>} : memref<8x128xbf16, #tpu.memory_space<vmem>>, vector<8x128xbf16>,
      %cst_57 = arith.constant 0xFF800000 : f32
      %95 = vector.broadcast %cst_57 : f32 to vector<8x1xf32>
      %c0_58 = arith.constant 0 : index
      %c0_59 = arith.constant 0 : index
      %96 = vector.load %arg17[%c0_58, %c0_59] : memref<8x1xf32, #tpu.memory_space<vmem>>, vector<8x1xf32>
      tpu.vector_store %arg17[%c0_58, %c0_59], %95 {strides = array<i32>} : memref<8x1xf32, #tpu.memory_space<vmem>>, vector<8x1xf32>,
      %cst_60 = arith.constant 0.000000e+00 : f32
      %97 = vector.broadcast %cst_60 : f32 to vector<8x1xf32>
      %c0_61 = arith.constant 0 : index
      %c0_62 = arith.constant 0 : index
      %98 = vector.load %arg18[%c0_61, %c0_62] : memref<8x1xf32, #tpu.memory_space<vmem>>, vector<8x1xf32>
      tpu.vector_store %arg18[%c0_61, %c0_62], %97 {strides = array<i32>} : memref<8x1xf32, #tpu.memory_space<vmem>>, vector<8x1xf32>,
    } else {
    }
    %c0 = arith.constant 0 : index
    %c0_1 = arith.constant 0 : index
    %3 = vector.load %arg15[%c0, %c0_1] : memref<8x128xbf16, #tpu.memory_space<vmem>>, vector<8x128xbf16>
    %c0_2 = arith.constant 0 : index
    %c0_3 = arith.constant 0 : index
    %4 = vector.load %arg10[%c0_2, %c0_3] : memref<256x128xbf16, #tpu.memory_space<vmem>>, vector<128x128xbf16>
    %cst = arith.constant dense<0.000000e+00> : vector<8x128xf32>
    %5 = tpu.matmul %3, %4, %cst {dimension_numbers = #tpu.dot_dimension_numbers<[1], [0], [0], [1], [0, 0, 1, 1], [], []>} : vector<8x128xbf16>, vector<128x128xbf16>, vector<8x128xf32> -> vector<8x128xf32>
    %c0_4 = arith.constant 0 : index
    %c0_5 = arith.constant 0 : index
    %6 = vector.load %arg16[%c0_4, %c0_5] : memref<8x128xbf16, #tpu.memory_space<vmem>>, vector<8x128xbf16>
    %c128 = arith.constant 128 : index
    %c0_6 = arith.constant 0 : index
    %7 = vector.load %arg10[%c128, %c0_6] : memref<256x128xbf16, #tpu.memory_space<vmem>>, vector<128x128xbf16>
    %cst_7 = arith.constant dense<0.000000e+00> : vector<8x128xf32>
    %8 = tpu.matmul %6, %7, %cst_7 {dimension_numbers = #tpu.dot_dimension_numbers<[1], [0], [0], [1], [0, 0, 1, 1], [], []>} : vector<8x128xbf16>, vector<128x128xbf16>, vector<8x128xf32> -> vector<8x128xf32>
    %9 = arith.addf %5, %8 : vector<8x128xf32>
    %c0_8 = arith.constant 0 : index
    %c0_9 = arith.constant 0 : index
    %10 = vector.load %arg11[%c0_8, %c0_9] : memref<1x128xf32, #tpu.memory_space<vmem>>, vector<1x128xf32>
    %11 = vector.broadcast %10 : vector<1x128xf32> to vector<8x128xf32>
    %12 = arith.addf %9, %11 : vector<8x128xf32>
    %c128_i32 = arith.constant 128 : i32
    %13 = arith.muli %arg1, %c128_i32 : i32
    %14 = tpu.assume_multiple %13, 128 : i32
    %c0_10 = arith.constant 0 : index
    %15 = arith.index_cast %14 : i32 to index
    %16 = vector.load %arg12[%c0_10, %15] : memref<8x256xf32, #tpu.memory_space<vmem>>, vector<8x128xf32>
    tpu.vector_store %arg12[%c0_10, %15], %12 {strides = array<i32>} : memref<8x256xf32, #tpu.memory_space<vmem>>, vector<8x128xf32>,
    %cst_11 = arith.constant dense<0xFF800000> : vector<8xf32>
    %17 = vector.multi_reduction <maximumf>, %12, %cst_11 [1] : vector<8x128xf32> to vector<8xf32>
    %18 = vector.shape_cast %17 : vector<8xf32> to vector<8x1xf32>
    %c0_12 = arith.constant 0 : index
    %c0_13 = arith.constant 0 : index
    %19 = vector.load %arg17[%c0_12, %c0_13] : memref<8x1xf32, #tpu.memory_space<vmem>>, vector<8x1xf32>
    %20 = arith.maximumf %19, %18 : vector<8x1xf32>
    %c0_14 = arith.constant 0 : index
    %c0_15 = arith.constant 0 : index
    %21 = vector.load %arg18[%c0_14, %c0_15] : memref<8x1xf32, #tpu.memory_space<vmem>>, vector<8x1xf32>
    %c0_16 = arith.constant 0 : index
    %c0_17 = arith.constant 0 : index
    %22 = vector.load %arg17[%c0_16, %c0_17] : memref<8x1xf32, #tpu.memory_space<vmem>>, vector<8x1xf32>
    %23 = arith.subf %22, %20 : vector<8x1xf32>
    %24 = math.exp %23 : vector<8x1xf32>
    %25 = arith.mulf %21, %24 : vector<8x1xf32>
    %26 = vector.broadcast %20 : vector<8x1xf32> to vector<8x128xf32>
    %27 = arith.subf %12, %26 : vector<8x128xf32>
    %28 = math.exp %27 : vector<8x128xf32>
    %cst_18 = arith.constant dense<0.000000e+00> : vector<8xf32>
    %29 = vector.multi_reduction <add>, %28, %cst_18 [1] : vector<8x128xf32> to vector<8xf32>
    %30 = vector.shape_cast %29 : vector<8xf32> to vector<8x1xf32>
    %31 = arith.addf %25, %30 : vector<8x1xf32>
    %c0_19 = arith.constant 0 : index
    %c0_20 = arith.constant 0 : index
    %32 = vector.load %arg18[%c0_19, %c0_20] : memref<8x1xf32, #tpu.memory_space<vmem>>, vector<8x1xf32>
    tpu.vector_store %arg18[%c0_19, %c0_20], %31 {strides = array<i32>} : memref<8x1xf32, #tpu.memory_space<vmem>>, vector<8x1xf32>,
    %c0_21 = arith.constant 0 : index
    %c0_22 = arith.constant 0 : index
    %33 = vector.load %arg17[%c0_21, %c0_22] : memref<8x1xf32, #tpu.memory_space<vmem>>, vector<8x1xf32>
    tpu.vector_store %arg17[%c0_21, %c0_22], %20 {strides = array<i32>} : memref<8x1xf32, #tpu.memory_space<vmem>>, vector<8x1xf32>,
    %c1_i32 = arith.constant 1 : i32
    %34 = arith.cmpi eq, %arg1, %c1_i32 : i32
    %35 = arith.extui %34 : i1 to i32
    %c0_i32_23 = arith.constant 0 : i32
    %36 = arith.cmpi ne, %35, %c0_i32_23 : i32
    scf.if %36 {
      %c0_24 = arith.constant 0 : index
      %c0_25 = arith.constant 0 : index
      %37 = vector.load %arg17[%c0_24, %c0_25] : memref<8x1xf32, #tpu.memory_space<vmem>>, vector<8x1xf32>
      %c0_26 = arith.constant 0 : index
      %c0_27 = arith.constant 0 : index
      %38 = vector.load %arg18[%c0_26, %c0_27] : memref<8x1xf32, #tpu.memory_space<vmem>>, vector<8x1xf32>
      %39 = math.log %38 : vector<8x1xf32>
      %40 = arith.addf %37, %39 : vector<8x1xf32>
      %c0_28 = arith.constant 0 : index
      %c0_29 = arith.constant 0 : index
      %41 = vector.load %arg12[%c0_28, %c0_29] : memref<8x256xf32, #tpu.memory_space<vmem>>, vector<8x256xf32>
      %42 = vector.broadcast %40 : vector<8x1xf32> to vector<8x256xf32>
      %43 = arith.subf %41, %42 : vector<8x256xf32>
      %c0_30 = arith.constant 0 : index
      %c0_31 = arith.constant 0 : index
      %44 = vector.load %arg12[%c0_30, %c0_31] : memref<8x256xf32, #tpu.memory_space<vmem>>, vector<8x256xf32>
      tpu.vector_store %arg12[%c0_30, %c0_31], %43 {strides = array<i32>} : memref<8x256xf32, #tpu.memory_space<vmem>>, vector<8x256xf32>,
    } else {
    }
    return
  }
  func.func @transform_0(%arg0: i32, %arg1: i32) -> (i32, i32) {
    %c0_i32 = arith.constant 0 : i32
    %c0_i32_0 = arith.constant 0 : i32
    return %arg0, %c0_i32 : i32, i32
  }
  func.func @transform_1(%arg0: i32, %arg1: i32) -> (i32, i32) {
    %c0_i32 = arith.constant 0 : i32
    %c0_i32_0 = arith.constant 0 : i32
    return %arg0, %c0_i32 : i32, i32
  }
  func.func @transform_2(%arg0: i32, %arg1: i32) -> (i32, i32, i32) {
    %c0_i32 = arith.constant 0 : i32
    %c0_i32_0 = arith.constant 0 : i32
    %c0_i32_1 = arith.constant 0 : i32
    return %arg0, %c0_i32, %c0_i32_0 : i32, i32, i32
  }
  func.func @transform_3(%arg0: i32, %arg1: i32) -> (i32, i32) {
    %c0_i32 = arith.constant 0 : i32
    %c0_i32_0 = arith.constant 0 : i32
    %c0_i32_1 = arith.constant 0 : i32
    return %c0_i32, %c0_i32_0 : i32, i32
  }
  func.func @transform_4(%arg0: i32, %arg1: i32) -> (i32, i32) {
    %c0_i32 = arith.constant 0 : i32
    %c0_i32_0 = arith.constant 0 : i32
    %c0_i32_1 = arith.constant 0 : i32
    return %c0_i32, %c0_i32_0 : i32, i32
  }
  func.func @transform_5(%arg0: i32, %arg1: i32) -> (i32, i32) {
    %c0_i32 = arith.constant 0 : i32
    %c0_i32_0 = arith.constant 0 : i32
    %c0_i32_1 = arith.constant 0 : i32
    return %c0_i32, %c0_i32_0 : i32, i32
  }
  func.func @transform_6(%arg0: i32, %arg1: i32) -> (i32, i32) {
    %c0_i32 = arith.constant 0 : i32
    %c0_i32_0 = arith.constant 0 : i32
    %c0_i32_1 = arith.constant 0 : i32
    return %c0_i32, %c0_i32_0 : i32, i32
  }
  func.func @transform_7(%arg0: i32, %arg1: i32) -> (i32, i32) {
    %c0_i32 = arith.constant 0 : i32
    %c0_i32_0 = arith.constant 0 : i32
    %c0_i32_1 = arith.constant 0 : i32
    return %c0_i32, %c0_i32_0 : i32, i32
  }
  func.func @transform_8(%arg0: i32, %arg1: i32) -> (i32, i32) {
    %c0_i32 = arith.constant 0 : i32
    %c0_i32_0 = arith.constant 0 : i32
    return %c0_i32, %arg1 : i32, i32
  }
  func.func @transform_9(%arg0: i32, %arg1: i32) -> (i32, i32) {
    %c0_i32 = arith.constant 0 : i32
    %c0_i32_0 = arith.constant 0 : i32
    return %c0_i32, %arg1 : i32, i32
  }
  func.func @transform_10(%arg0: i32, %arg1: i32) -> (i32, i32) {
    %c0_i32 = arith.constant 0 : i32
    %c0_i32_0 = arith.constant 0 : i32
    return %arg0, %c0_i32 : i32, i32
  }
  func.func @transform_11(%arg0: i32, %arg1: i32) -> (i32, i32) {
    %c0_i32 = arith.constant 0 : i32
    %c0_i32_0 = arith.constant 0 : i32
    return %arg0, %c0_i32 : i32, i32
  }
  func.func @transform_12(%arg0: i32, %arg1: i32) -> (i32, i32) {
    %c0_i32 = arith.constant 0 : i32
    %c0_i32_0 = arith.constant 0 : i32
    return %arg0, %c0_i32 : i32, i32
  }
}

</mosaic_0001>

<bundles_post_ra>
// kernel: luong_decoder_forward.1
= control target key start
LH: loop header
LB: loop body
LE: loop exit
PB: predicated region body
PF: predicated region fallthrough
CT: control target
= control target key end

     0   :  { %s5651_s0 = inlined_call_operand.vmem [shape: bf16[16,256], index: 0, kind: input, shape index: {}]   ;;  %s5652_s1 = inlined_call_operand.vmem [shape: f32[16,128], index: 1, kind: input, shape index: {}]   ;;  %s5653_s2 = inlined_call_operand.vmem [shape: bf16[16,128,128], index: 2, kind: input, shape index: {}]   ;;  %s5654_s3 = inlined_call_operand.vmem [shape: bf16[256,384], index: 3, kind: input, shape index: {}]   ;;  %s5655_s4 = inlined_call_operand.vmem [shape: bf16[128,128], index: 4, kind: input, shape index: {}]   ;;  %s5656_s5 = inlined_call_operand.vmem [shape: f32[1,256], index: 5, kind: input, shape index: {}]   ;;  %s5657_s6 = inlined_call_operand.vmem [shape: f32[1,128], index: 6, kind: input, shape index: {}]   ;;  %s5658_s7 = inlined_call_operand.vmem [shape: f32[1,128], index: 7, kind: input, shape index: {}]   ;;  %s5659_s8 = inlined_call_operand.vmem [shape: bf16[256,256], index: 8, kind: input, shape index: {}]   ;;  %s5660_s9 = inlined_call_operand.vmem [shape: f32[1,256], index: 9, kind: input, shape index: {}]   ;;  %s5661_s10 = inlined_call_operand.hbm [shape: f32[16,256], index: 10, kind: output, shape index: {0}]   ;;  %s5662_s11 = inlined_call_operand.hbm [shape: f32[16,128], index: 11, kind: output, shape index: {1}]   ;;  %s5663_s12 = inlined_call_operand.hbm [shape: f32[16,128], index: 12, kind: output, shape index: {2}]  }
   0x1   :  { %5685 = sst [smem:[#allocation34_spill]] %s5651_s0 }
   0x2   :  { %5686 = sst [smem:[#allocation35_spill]] %s5652_s1 }
   0x3   :  { %5687 = sst [smem:[#allocation36_spill]] %s5653_s2 }
   0x4   :  { %5688 = sst [smem:[#allocation37_spill]] %s5659_s8 }
   0x5   :  { %5689 = sst [smem:[#allocation38_spill]] %s5661_s10 }
   0x6   :  { %5690 = sst [smem:[#allocation39_spill]] %s5662_s11 }
   0x7   :  { %5691 = sst [smem:[#allocation40_spill]] %s5663_s12 }
   0x8   :  { %18 = vsyncpa [#allocation8], 0 }
   0x9   :  { %20 = vsyncpa [#allocation8 + $0x1], 0 }
   0xa   :  { %21 = vsyncpa [#allocation10], 0 }
   0xb   :  { %23 = vsyncpa [#allocation10 + $0x1], 0  ;;  %s4505_s21 = smov 0   ;;  %s4507_s22 = smov 0  }
   0xc   :  { %s4509_s23 = smov 0   ;;  %s4511_s24 = smov 0  }
   0xd   :  { %s4513_s25 = smov 0   ;;  %s4515_s26 = smov 0  }
   0xe   :  { %s4517_s27 = smov 0   ;;  %s4519_s28 = smov 0  }
   0xf   :  { %s4521_s29 = smov 0   ;;  %s4523_s30 = smov 0  }
  0x10 LB: > { %5692 = sst [smem:[#allocation14_spill]] %s4391_s21  ;;  %s38_s15 = sadd.s32 1, %s4419_s28  ;;  %s4427_s30 = sphi %s4523_s30, %s29_s30   ;;  %s4423_s29 = sphi %s4521_s29, %s5747_s29   ;;  %s4419_s28 = sphi %s4519_s28, %s5746_s28   ;;  %s4415_s27 = sphi %s4517_s27, %s5745_s27   ;;  %s4411_s26 = sphi %s4515_s26, %s5744_s26   ;;  %s4407_s25 = sphi %s4513_s25, %s5743_s25   ;;  %s4403_s24 = sphi %s4511_s24, %s5742_s24   ;;  %s4399_s23 = sphi %s4509_s23, %s5741_s23   ;;  %s4395_s22 = sphi %s4507_s22, %s5740_s22   ;;  %s4391_s21 = sphi %s4505_s21, %s5739_s21  }
  0x11   : > { %5693 = sst [smem:[#allocation15_spill]] %s4395_s22  ;;  %s41_s16 = sadd.s32 1, %s4423_s29 }
  0x12   : > { %5694 = sst [smem:[#allocation16_spill]] %s4399_s23  ;;  %p39_p0 = scmp.ge.s32.totalorder %s38_s15, 2 }
  0x13   : > { %5695 = sst [smem:[#allocation17_spill]] %s4407_s25  ;;  %s231_s17 = sadd.s32 1, %s4407_s25 }
  0x14   : > { %5696 = sst [smem:[#allocation18_spill]] %s4419_s28  ;;  %p238_p1 = scmp.ne.s32.totalorder %s4407_s25, %s4403_s24 }
  0x15   : > { %5697 = sst [smem:[#allocation19_spill]] %s4423_s29  ;;  %p239_p2 = scmp.eq.s32.totalorder %s4427_s30, 0 }
  0x16   : > { %s5749_s15 = smov (%p39_p0, %s38_s15), 0  ;;  %s5751_s16 = smov (!%p39_p0, %s41_s16), %s4423_s29 }
  0x17   : > { %5698 = sst [smem:[#allocation20_spill]] %s5749_s15  ;;  %s228_s18 = ssub.s32 %s4419_s28, %s5749_s15 }
  0x18   : > { %p4568_p3 = por %p239_p2, %p238_p1  ;;  %p43_p4 = scmp.ge.s32.totalorder %s5751_s16, 2 }
  0x19   : > { %p229_p5 = scmp.eq.s32.totalorder %s228_s18, 0  ;;  %s283_s20 = sadd.s32 1, %s4399_s23 }
  0x1a   : > { %p293_p6 = scmp.ne.s32.totalorder %s4399_s23, %s4395_s22  ;;  %s5753_s16 = smov (%p43_p4, %s5751_s16), 0 }
  0x1b   : > { %5700 = sst [smem:[#allocation21_spill]] %s5753_s16  ;;  %s280_s13 = ssub.s32 %s4423_s29, %s5753_s16 }
  0x1c   : > { %s4578_s14 = scalar_select %p229_p5, %s4407_s25, %s231_s17  }
  0x1d   : > { %s5702_s12 = sadd.s32 4294967295, %s4427_s30   ;;  %p281_p8 = scmp.eq.s32.totalorder %s280_s13, 0 }
  0x1e   : > { %5701 = sst [smem:[#allocation22_spill]] %s4578_s14  ;;  %p294_p7 = scmp.eq.s32.totalorder %s5702_s12, 3 }
  0x1f   : > { %p299_p9 = scmp.ne.s32.totalorder %s4395_s22, %s4391_s21  ;;  %s5704_s10 = sadd.s32 4294967294, %s4427_s30  }
  0x20   : > { %p4586_p10 = por %p294_p7, %p293_p6  ;;  %p300_p11 = scmp.eq.s32.totalorder %s5704_s10, 3 }
  0x21   : > { %s4593_s11 = scalar_select %p281_p8, %s4399_s23, %s283_s20  }
  0x22   : > { %p4595_p12 = por %p300_p11, %p299_p9  ;;  %p3182_p13 = scmp.ge.s32.totalorder %s4427_s30, 4 }
  0x23   : > { %5705 = sst [smem:[#allocation23_spill]] %s4593_s11 }
  0x24   : > { %s5706_s18 = scalar_select %p4595_p12, 1, 0 }
  0x25   : > { %383 = sbr.rel (%p3182_p13) target bundleno = 75 (0x4b), region = 36 }
  0x26   : > { %5707 = sst [smem:[#allocation24_spill]] %s5706_s18 }
  0x2c   : > { %411 = sbr.rel (!%p4568_p3) target bundleno = 75 (0x4b), region = 52  ;;  %s413_s12 = sand.u32 (%p4568_p3), 1, %s4407_s25  }
  0x2d   : > { %s3184_s13 = sshll.u32 (%p4568_p3), %s4419_s28, 2  ;;  %s3183_s17 = sshll.u32 (%p4568_p3), %s413_s12, 7 }
  0x2e   : > { %s5708_s8 = sld [smem:[#allocation37_spill]] (%p4568_p3)  ;;  %s4611_s19 = scalar_lea.vmem (%p4568_p3), [#allocation6], %s3183_s17 }
  0x34   : > { %s4607_s10 = scalar_lea.vmem %s5708_s8, %s3184_s13 }
  0x35   : > { %v433_v0 = vld [vmem:[%s4607_s10] sm:$0xf]  ;;  %v435_v1 = vld [vmem:[%s4607_s10 + $0x8] sm:$0xf]  ;;  %v437_v2 = vld [vmem:[%s4607_s10 + $0x10] sm:$0xf] }
  0x36   : > { %434 = vst [vmem:[%s4611_s19] sm:$0xf] %v433_v0  ;;  %436 = vst [vmem:[%s4611_s19 + $0x4] sm:$0xf] %v435_v1  ;;  %v439_v3 = vld [vmem:[%s4607_s10 + $0x18] sm:$0xf] }
  0x37   : > { %v441_v4 = vld [vmem:[%s4607_s10 + $0x20] sm:$0xf]  ;;  %438 = vst [vmem:[%s4611_s19 + $0x8] sm:$0xf] %v437_v2  ;;  %440 = vst [vmem:[%s4611_s19 + $0xc] sm:$0xf] %v439_v3 }
  0x38   : > { %442 = vst [vmem:[%s4611_s19 + $0x10] sm:$0xf] %v441_v4  ;;  %v443_v5 = vld [vmem:[%s4607_s10 + $0x28] sm:$0xf]  ;;  %v445_v6 = vld [vmem:[%s4607_s10 + $0x30] sm:$0xf] }
  0x39   : > { %v447_v7 = vld [vmem:[%s4607_s10 + $0x38] sm:$0xf]  ;;  %444 = vst [vmem:[%s4611_s19 + $0x14] sm:$0xf] %v443_v5  ;;  %446 = vst [vmem:[%s4611_s19 + $0x18] sm:$0xf] %v445_v6 }
  0x3a   : > { %448 = vst [vmem:[%s4611_s19 + $0x1c] sm:$0xf] %v447_v7  ;;  %v449_v8 = vld [vmem:[%s4607_s10 + $0x40] sm:$0xf]  ;;  %v451_v9 = vld [vmem:[%s4607_s10 + $0x48] sm:$0xf] }
  0x3b   : > { %v453_v10 = vld [vmem:[%s4607_s10 + $0x50] sm:$0xf]  ;;  %450 = vst [vmem:[%s4611_s19 + $0x20] sm:$0xf] %v449_v8  ;;  %452 = vst [vmem:[%s4611_s19 + $0x24] sm:$0xf] %v451_v9 }
  0x3c   : > { %454 = vst [vmem:[%s4611_s19 + $0x28] sm:$0xf] %v453_v10  ;;  %v455_v11 = vld [vmem:[%s4607_s10 + $0x58] sm:$0xf]  ;;  %v457_v12 = vld [vmem:[%s4607_s10 + $0x60] sm:$0xf] }
  0x3d   : > { %v459_v13 = vld [vmem:[%s4607_s10 + $0x68] sm:$0xf]  ;;  %456 = vst [vmem:[%s4611_s19 + $0x2c] sm:$0xf] %v455_v11  ;;  %458 = vst [vmem:[%s4611_s19 + $0x30] sm:$0xf] %v457_v12 }
  0x3e   : > { %460 = vst [vmem:[%s4611_s19 + $0x34] sm:$0xf] %v459_v13  ;;  %v461_v14 = vld [vmem:[%s4607_s10 + $0x70] sm:$0xf]  ;;  %v463_v15 = vld [vmem:[%s4607_s10 + $0x78] sm:$0xf] }
  0x3f   : > { %v465_v16 = vld [vmem:[%s4607_s10 + $0x80] sm:$0xf]  ;;  %462 = vst [vmem:[%s4611_s19 + $0x38] sm:$0xf] %v461_v14  ;;  %464 = vst [vmem:[%s4611_s19 + $0x3c] sm:$0xf] %v463_v15 }
  0x40   : > { %466 = vst [vmem:[%s4611_s19 + $0x40] sm:$0xf] %v465_v16  ;;  %v467_v17 = vld [vmem:[%s4607_s10 + $0x88] sm:$0xf]  ;;  %v469_v18 = vld [vmem:[%s4607_s10 + $0x90] sm:$0xf] }
  0x41   : > { %v471_v19 = vld [vmem:[%s4607_s10 + $0x98] sm:$0xf]  ;;  %468 = vst [vmem:[%s4611_s19 + $0x44] sm:$0xf] %v467_v17  ;;  %470 = vst [vmem:[%s4611_s19 + $0x48] sm:$0xf] %v469_v18 }
  0x42   : > { %472 = vst [vmem:[%s4611_s19 + $0x4c] sm:$0xf] %v471_v19  ;;  %v473_v20 = vld [vmem:[%s4607_s10 + $0xa0] sm:$0xf]  ;;  %v475_v21 = vld [vmem:[%s4607_s10 + $0xa8] sm:$0xf] }
  0x43   : > { %v477_v22 = vld [vmem:[%s4607_s10 + $0xb0] sm:$0xf]  ;;  %474 = vst [vmem:[%s4611_s19 + $0x50] sm:$0xf] %v473_v20  ;;  %476 = vst [vmem:[%s4611_s19 + $0x54] sm:$0xf] %v475_v21 }
  0x44   : > { %478 = vst [vmem:[%s4611_s19 + $0x58] sm:$0xf] %v477_v22  ;;  %v479_v23 = vld [vmem:[%s4607_s10 + $0xb8] sm:$0xf]  ;;  %v481_v24 = vld [vmem:[%s4607_s10 + $0xc0] sm:$0xf] }
  0x45   : > { %v483_v25 = vld [vmem:[%s4607_s10 + $0xc8] sm:$0xf]  ;;  %480 = vst [vmem:[%s4611_s19 + $0x5c] sm:$0xf] %v479_v23  ;;  %482 = vst [vmem:[%s4611_s19 + $0x60] sm:$0xf] %v481_v24 }
  0x46   : > { %484 = vst [vmem:[%s4611_s19 + $0x64] sm:$0xf] %v483_v25  ;;  %v485_v26 = vld [vmem:[%s4607_s10 + $0xd0] sm:$0xf]  ;;  %v487_v27 = vld [vmem:[%s4607_s10 + $0xd8] sm:$0xf] }
  0x47   : > { %v489_v28 = vld [vmem:[%s4607_s10 + $0xe0] sm:$0xf]  ;;  %486 = vst [vmem:[%s4611_s19 + $0x68] sm:$0xf] %v485_v26  ;;  %488 = vst [vmem:[%s4611_s19 + $0x6c] sm:$0xf] %v487_v27 }
  0x48   : > { %490 = vst [vmem:[%s4611_s19 + $0x70] sm:$0xf] %v489_v28  ;;  %v491_v29 = vld [vmem:[%s4607_s10 + $0xe8] sm:$0xf]  ;;  %v493_v30 = vld [vmem:[%s4607_s10 + $0xf0] sm:$0xf] }
  0x49   : > { %v495_v31 = vld [vmem:[%s4607_s10 + $0xf8] sm:$0xf]  ;;  %492 = vst [vmem:[%s4611_s19 + $0x74] sm:$0xf] %v491_v29  ;;  %494 = vst [vmem:[%s4611_s19 + $0x78] sm:$0xf] %v493_v30 }
  0x4a   : > { %496 = vst [vmem:[%s4611_s19 + $0x7c] sm:$0xf] %v495_v31 }
  0x4b PF: > { %p3185_p0 = scmp.ge.s32.totalorder %s4427_s30, 1  ;;  %p588_p1 = scmp.lt.s32.totalorder %s4427_s30, 5 }
  0x4d   : > { %p589_p2 = pnand %p3185_p0, %p588_p1 }
  0x4f   : > { %592 = sbr.rel (%p589_p2) target bundleno = 2299 (0x8fb), region = 97 }
  0x56   : > { %s595_s29 = sand.u32 1, %s4403_s24   ;;  %s4679_s16 = sand.u32 1, %s4395_s22  }
  0x57   : > { %5709 = sst [smem:[#allocation25_spill]] %s4679_s16  ;;  %s3186_s20 = sshll.u32 %s595_s29, 7 }
  0x58   : > { %s3187_s12 = sshll.u32 %s4679_s16, 4  ;;  %s3188_s13 = sshll.u32 %s4679_s16, 3 }
  0x59   : > { %p664_p3 = scmp.lt.s32.totalorder %s4415_s27, 1  ;;  %s3193_s10 = sshll.u32 %s4415_s27, 3 }
  0x5a   : > { %p680_p4 = scmp.lt.s32.totalorder %s4411_s26, 1  ;;  %p674_p5 = scmp.lt.s32.totalorder %s3193_s10, 15 }
  0x5b   : > { %s665_s17 = scalar_select %p664_p3, %s4415_s27, 1 }
  0x5c   : > { %s5710_s0 = sld [smem:[#allocation34_spill]]  ;;  %s5711_s1 = sld [smem:[#allocation35_spill]] }
  0x5d   : > { %s3364_s19 = sshll.u32 %s665_s17, 3  ;;  %s5755_s10 = smov (!%p674_p5, %s3193_s10), 15 }
  0x5e   : > { %s4698_s29 = scalar_select %p680_p4, %s4411_s26, 1 }
  0x5f   : > { %s3365_s23 = sshll.u32 %s5755_s10, 6  ;;  %s5712_s2 = sld [smem:[#allocation36_spill]] }
  0x60   : > { %s682_s8 = scalar_lea.vmem %s5660_s9, %s4698_s29  ;;  %s4709_s28 = scalar_lea.vmem [#allocation6], %s3186_s20 }
  0x61   : > { %s4713_s25 = scalar_lea.vmem [#allocation9], %s3188_s13  ;;  %p3196_p6 = scmp.ne.s32.totalorder %s4411_s26, 0 }
  0x62   : > { %s4690_s14 = scalar_lea.vmem %s5710_s0, %s3364_s19  ;;  %s4695_s11 = scalar_lea.vmem %s5711_s1, %s3364_s19 }
  0x63   : > { %s4711_s0 = scalar_lea.vmem [#allocation7], %s3187_s12  ;;  %s4715_s19 = scalar_lea.vmem [#allocation11], %s3188_s13 }
  0x64   : > { %687 = sbr.rel (%p3196_p6) target bundleno = 1385 (0x569), region = 105 }
  0x65   : > { %s4703_s17 = scalar_lea.vmem %s5712_s2, %s3365_s23 }
  0x6b   : > { %v4053_v32 = vld [vmem:[%s5654_s3 + $0x4] ss:$12 sps:$4 sm:$0xff]   ;;  %v4055_v33 = vld [vmem:[%s5654_s3 + $0xc8] ss:$12 sps:$4 sm:$0xff]   ;;  %v4056_v34 = vld [vmem:[%s5654_s3] ss:$12 sps:$4 sm:$0xff]  }
  0x6c   : > { %1017 = vmatprep.subr.bf16.mxu0 %v4053_v32  ;;  %3375 = vmatprep.subr.bf16.mxu1 %v4055_v33  ;;  %v4057_v35 = vld [vmem:[%s5654_s3 + $0x8] ss:$12 sps:$4 sm:$0xff]   ;;  %v4060_v37 = vld [vmem:[%s5654_s3 + $0xe0] ss:$12 sps:$4 sm:$0xff]   ;;  %v4061_v38 = vld [vmem:[%s5654_s3 + $0x18] ss:$12 sps:$4 sm:$0xff]  }
  0x6d   : > { %1018 = vmatpush1.bf16.msra.mxu0 %v4056_v34  ;;  %v4058_v36 = vld [vmem:[%s5654_s3 + $0x1c] ss:$12 sps:$4 sm:$0xff]   ;;  %3376 = vmatpush3.bf16.msra.mxu1 %v4057_v35  ;;  %v4062_v39 = vld [vmem:[%s5654_s3 + $0x20] ss:$12 sps:$4 sm:$0xff]   ;;  %v4065_v41 = vld [vmem:[%s5654_s3 + $0xf8] ss:$12 sps:$4 sm:$0xff]  }
  0x6e   : > { %1019 = vmatprep.subr.bf16.mxu0 %v4058_v36  ;;  %3377 = vmatprep.subr.bf16.mxu1 %v4060_v37  ;;  %v4063_v40 = vld [vmem:[%s5654_s3 + $0x34] ss:$12 sps:$4 sm:$0xff]   ;;  %v4066_v42 = vld [vmem:[%s5654_s3 + $0x30] ss:$12 sps:$4 sm:$0xff]   ;;  %v4067_v43 = vld [vmem:[%s5654_s3 + $0x38] ss:$12 sps:$4 sm:$0xff]  }
  0x6f   : > { %v4068_v44 = vld [vmem:[%s5654_s3 + $0x4c] ss:$12 sps:$4 sm:$0xff]   ;;  %v4070_v45 = vld [vmem:[%s5654_s3 + $0x110] ss:$12 sps:$4 sm:$0xff]   ;;  %v4071_v46 = vld [vmem:[%s5654_s3 + $0x48] ss:$12 sps:$4 sm:$0xff]  }
  0x70   : > { %v4072_v47 = vld [vmem:[%s5654_s3 + $0x50] ss:$12 sps:$4 sm:$0xff]   ;;  %v4075_v49 = vld [vmem:[%s5654_s3 + $0x128] ss:$12 sps:$4 sm:$0xff]   ;;  %v4076_v50 = vld [vmem:[%s5654_s3 + $0x60] ss:$12 sps:$4 sm:$0xff]  }
  0x71   : > { %1020 = vmatpush1.bf16.msra.mxu0 %v4061_v38  ;;  %3378 = vmatpush3.bf16.msra.mxu1 %v4062_v39  ;;  %v4073_v48 = vld [vmem:[%s5654_s3 + $0x64] ss:$12 sps:$4 sm:$0xff]   ;;  %v4077_v51 = vld [vmem:[%s5654_s3 + $0x68] ss:$12 sps:$4 sm:$0xff]   ;;  %v4080_v53 = vld [vmem:[%s5654_s3 + $0x140] ss:$12 sps:$4 sm:$0xff]  }
  0x72   : > { %1021 = vmatprep.subr.bf16.mxu0 %v4063_v40  ;;  %3379 = vmatprep.subr.bf16.mxu1 %v4065_v41  ;;  %v4078_v52 = vld [vmem:[%s5654_s3 + $0x7c] ss:$12 sps:$4 sm:$0xff]   ;;  %v4081_v54 = vld [vmem:[%s5654_s3 + $0x78] ss:$12 sps:$4 sm:$0xff]   ;;  %v4082_v55 = vld [vmem:[%s5654_s3 + $0x80] ss:$12 sps:$4 sm:$0xff]  }
  0x73   : > { %v4083_v56 = vld [vmem:[%s5654_s3 + $0x94] ss:$12 sps:$4 sm:$0xff]   ;;  %v4085_v57 = vld [vmem:[%s5654_s3 + $0x158] ss:$12 sps:$4 sm:$0xff]   ;;  %v4086_v58 = vld [vmem:[%s5654_s3 + $0x90] ss:$12 sps:$4 sm:$0xff]  }
  0x74   : > { %v4087_v59 = vld [vmem:[%s5654_s3 + $0x98] ss:$12 sps:$4 sm:$0xff]   ;;  %v4090_v61 = vld [vmem:[%s5654_s3 + $0x170] ss:$12 sps:$4 sm:$0xff]   ;;  %v4091_v62 = vld [vmem:[%s5654_s3 + $0xa8] ss:$12 sps:$4 sm:$0xff]  }
  0x75   : > { %1022 = vmatpush1.bf16.msra.mxu0 %v4066_v42  ;;  %3380 = vmatpush3.bf16.msra.mxu1 %v4067_v43  ;;  %v4088_v60 = vld [vmem:[%s5654_s3 + $0xac] ss:$12 sps:$4 sm:$0xff]   ;;  %v689_v63 = vld [vmem:[%s4690_s14] sm:$0xff]  ;;  %v4092_v0 = vld [vmem:[%s5654_s3 + $0xb0] ss:$12 sps:$4 sm:$0xff]   ;;  %v4429_v7 = vmov 0.0  }
  0x76   : > { %1023 = vmatprep.subr.bf16.mxu0 %v4068_v44  ;;  %3381 = vmatprep.subr.bf16.mxu1 %v4070_v45  ;;  %v3198_v1 = vcombine.high %v689_v63, %v689_v63  ;;  %v4093_v2 = vld [vmem:[%s5654_s3 + $0xc4] ss:$12 sps:$4 sm:$0xff]   ;;  %v4818_v3 = vcombine.low %v689_v63, %v689_v63  ;;  %v4097_v4 = vld [vmem:[%s5654_s3 + $0xc0] ss:$12 sps:$4 sm:$0xff]   ;;  %v4099_v6 = vld [vmem:[%s5654_s3 + $0xdc] ss:$12 sps:$4 sm:$0xff]  }
  0x77   : > { %v4098_v5 = vld [vmem:[%s5655_s4] sm:$0xff]   ;;  %v4102_v9 = vld [vmem:[%s5655_s4 + $0x8] sm:$0xff]   ;;  %vm4430_vm0 = vmmov 0   ;;  %v4105_v11 = vld [vmem:[%s5654_s3 + $0xf0] ss:$12 sps:$4 sm:$0xff]   ;;  %vm2167_vm1 = vcmask 1040384  }
  0x78   : > { %1090 = vmatprep.mubr.bf16.mxu1 %v3198_v1  ;;  %1049 = vmatprep.mubr.bf16.mxu0 %v3198_v1  ;;  %v4101_v8 = vld [vmem:[%s5654_s3 + $0xd8] ss:$12 sps:$4 sm:$0xff]   ;;  %v4103_v10 = vld [vmem:[%s5654_s3 + $0xf4] ss:$12 sps:$4 sm:$0xff]   ;;  %v4115_v19 = vld [vmem:[%s5654_s3 + $0x13c] ss:$12 sps:$4 sm:$0xff]  }
  0x79   : > { %1024 = vmatpush1.bf16.msra.mxu0 %v4071_v46  ;;  %3382 = vmatpush3.bf16.msra.mxu1 %v4072_v47  ;;  %v4106_v12 = vld [vmem:[%s5655_s4 + $0x10] sm:$0xff]   ;;  %v4107_v13 = vld [vmem:[%s5654_s3 + $0x10c] ss:$12 sps:$4 sm:$0xff]   ;;  %v4114_v18 = vld [vmem:[%s5655_s4 + $0x20] sm:$0xff]   ;;  %vm2594_vm2 = vcmask 1041409   ;;  %vm2597_vm3 = vcmask 1042434  }
  0x7a   : > { %1025 = vmatprep.subr.bf16.mxu0 %v4073_v48  ;;  %3383 = vmatprep.subr.bf16.mxu1 %v4075_v49  ;;  %v4109_v14 = vld [vmem:[%s5654_s3 + $0x108] ss:$12 sps:$4 sm:$0xff]   ;;  %v4110_v15 = vld [vmem:[%s5655_s4 + $0x18] sm:$0xff]   ;;  %v4111_v16 = vld [vmem:[%s5654_s3 + $0x124] ss:$12 sps:$4 sm:$0xff]   ;;  %vm2600_vm4 = vcmask 1043459  }
  0x7b   : > { %v4113_v17 = vld [vmem:[%s5654_s3 + $0x120] ss:$12 sps:$4 sm:$0xff]   ;;  %v4117_v20 = vld [vmem:[%s5654_s3 + $0x138] ss:$12 sps:$4 sm:$0xff]   ;;  %v4121_v23 = vld [vmem:[%s5654_s3 + $0x150] ss:$12 sps:$4 sm:$0xff]  }
  0x7c   : > { %v4118_v21 = vld [vmem:[%s5655_s4 + $0x28] sm:$0xff]   ;;  %v4119_v22 = vld [vmem:[%s5654_s3 + $0x154] ss:$12 sps:$4 sm:$0xff]   ;;  %v4126_v27 = vld [vmem:[%s5655_s4 + $0x38] sm:$0xff]   ;;  %vm2603_vm5 = vcmask 1044484   ;;  %vm2606_vm6 = vcmask 1045509  }
  0x7d   : > { %1026 = vmatpush1.bf16.msra.mxu0 %v4076_v50  ;;  %3384 = vmatpush3.bf16.msra.mxu1 %v4077_v51  ;;  %v4122_v24 = vld [vmem:[%s5655_s4 + $0x30] sm:$0xff]   ;;  %v4123_v25 = vld [vmem:[%s5654_s3 + $0x16c] ss:$12 sps:$4 sm:$0xff]   ;;  %v4900_v28 = vld [vmem:[%s4695_s11] sm:$0xff]  ;;  %v1205_v51 = vlaneseq  ;;  %vm2609_vm7 = vcmask 1046534   ;;  %vm2612_vm8 = vcmask 1047559  }
  0x7e   : > { %1027 = vmatprep.subr.bf16.mxu0 %v4078_v52  ;;  %3385 = vmatprep.subr.bf16.mxu1 %v4080_v53  ;;  %v4125_v26 = vld [vmem:[%s5654_s3 + $0x168] ss:$12 sps:$4 sm:$0xff]   ;;  %v1098_v29 = vpack.c.bf16 %v4900_v28, %v4900_v28  ;;  %v4913_v30 = vld [vmem:[%s4703_s17] sm:$0xff]   ;;  %v4943_v36 = vld [vmem:[%s4703_s17 + $0x18] sm:$0xff]   ;;  %vm2674_vm9 = vcmask 7168  }
  0x7f   : > { %v4916_v31 = vld [vmem:[%s4703_s17 + $0x40] sm:$0xff]   ;;  %v4923_v32 = vld [vmem:[%s4703_s17 + $0x8] sm:$0xff]   ;;  %v4933_v34 = vld [vmem:[%s4703_s17 + $0x10] sm:$0xff]   ;;  %v1206_v52 = vshrl.u32 %v1205_v51, 7  ;;  %2676 = vst.msk [vmem:[#allocation5] sm:$0xff] %vm2674_vm9, %v4429_v7 }
  0x80   : > { %v4927_v33 = vld [vmem:[%s4703_s17 + $0x48] sm:$0xff]   ;;  %v4937_v35 = vld [vmem:[%s4703_s17 + $0x50] sm:$0xff]   ;;  %v4947_v37 = vld [vmem:[%s4703_s17 + $0x58] sm:$0xff]  }
  0x81   : > { %1028 = vmatpush1.bf16.msra.mxu0 %v4081_v54  ;;  %3386 = vmatpush3.bf16.msra.mxu1 %v4082_v55  ;;  %v4953_v38 = vld [vmem:[%s4703_s17 + $0x20] sm:$0xff]   ;;  %v4963_v40 = vld [vmem:[%s4703_s17 + $0x28] sm:$0xff]   ;;  %v4973_v42 = vld [vmem:[%s4703_s17 + $0x30] sm:$0xff]   ;;  %v4992_v53 = vsub.s32 0, %v1206_v52  ;;  %v1211_v55 = vsub.s32 1, %v1206_v52 }
  0x82   : > { %1029 = vmatprep.subr.bf16.mxu0 %v4083_v56  ;;  %3387 = vmatprep.subr.bf16.mxu1 %v4085_v57  ;;  %v4957_v39 = vld [vmem:[%s4703_s17 + $0x60] sm:$0xff]   ;;  %v4967_v41 = vld [vmem:[%s4703_s17 + $0x68] sm:$0xff]   ;;  %v4977_v43 = vld [vmem:[%s4703_s17 + $0x70] sm:$0xff]  }
  0x83   : > { %v4983_v44 = vld [vmem:[%s4703_s17 + $0x38] sm:$0xff]   ;;  %v1203_v54 = vld [vmem:[%s5656_s5] sm:$0x3] }
  0x84   : > { %v4986_v45 = vld [vmem:[%s4703_s17 + $0x78] sm:$0xff]   ;;  %v1208_v56 = vrot.slane %v1203_v54, %v4992_v53 }
  0x85   : > { %1030 = vmatpush1.bf16.msra.mxu0 %v4086_v58  ;;  %3388 = vmatpush3.bf16.msra.mxu1 %v4087_v59  ;;  %v1212_v58 = vrot.slane %v1203_v54, %v1211_v55  ;;  %v5014_v55 = vld [vmem:[%s4703_s17 + $0x80] sm:$0xff]  }
  0x86   : > { %1031 = vmatprep.subr.bf16.mxu0 %v4088_v60  ;;  %3389 = vmatprep.subr.bf16.mxu1 %v4090_v61 }
  0x89   : > { %1032 = vmatpush1.bf16.msra.mxu0 %v4091_v62  ;;  %3390 = vmatpush3.bf16.msra.mxu1 %v4092_v0 }
  0x8a   : > { %1033 = vmatprep.subr.bf16.mxu0 %v4093_v2  ;;  %3568 = vmatprep.subr.bf16.mxu1 %v4429_v7 }
  0x8c   : > { %1091 = vmatmul.mubr.bf16.vlgmr.msra.gmra.mrb[0].mxu1 %v4818_v3 }
  0x8d   : > { %1034 = vmatpush1.bf16.msra.mxu0 %v4097_v4  ;;  %3569 = vmatpush3.bf16.msra.mxu1 %v4098_v5 }
  0x8e   : > { %1035 = vmatprep.subr.bf16.mxu0 %v4099_v6  ;;  %3570 = vmatprep.subr.bf16.mxu1 %v4429_v7 }
  0x8f   : > { %3584 = vmatprep.mubr.msk.bf16.mxu1 %vm4430_vm0, %v4429_v7 }
  0x91   : > { %1036 = vmatpush1.bf16.msra.mxu0 %v4101_v8  ;;  %3571 = vmatpush3.bf16.msra.mxu1 %v4102_v9 }
  0x92   : > { %1037 = vmatprep.subr.bf16.mxu0 %v4103_v10  ;;  %3572 = vmatprep.subr.bf16.mxu1 %v4429_v7 }
  0x95   : > { %1038 = vmatpush1.bf16.msra.mxu0 %v4105_v11  ;;  %3573 = vmatpush3.bf16.msra.mxu1 %v4106_v12  ;;  %v3258_v11 = vld [vmem:[%s5658_s7] ss:$0 sm:$0xff] }
  0x96   : > { %1039 = vmatprep.subr.bf16.mxu0 %v4107_v13  ;;  %3574 = vmatprep.subr.bf16.mxu1 %v4429_v7 }
  0x99   : > { %1040 = vmatpush1.bf16.msra.mxu0 %v4109_v14  ;;  %3575 = vmatpush3.bf16.msra.mxu1 %v4110_v15  ;;  %v3257_v14 = vld [vmem:[%s5657_s6] ss:$0 sm:$0xff] }
  0x9a   : > { %1041 = vmatprep.subr.bf16.mxu0 %v4111_v16  ;;  %3576 = vmatprep.subr.bf16.mxu1 %v4429_v7 }
  0x9d   : > { %1042 = vmatpush1.bf16.msra.mxu0 %v4113_v17  ;;  %3577 = vmatpush3.bf16.msra.mxu1 %v4114_v18 }
  0x9e   : > { %1043 = vmatprep.subr.bf16.mxu0 %v4115_v19  ;;  %3578 = vmatprep.subr.bf16.mxu1 %v4429_v7  ;;  %v4431_v19 = vmov 1966171168  }
  0xa1   : > { %1044 = vmatpush1.bf16.msra.mxu0 %v4117_v20  ;;  %3579 = vmatpush3.bf16.msra.mxu1 %v4118_v21  ;;  %v1384_v20 = vunpack.c.l.s4 %v4431_v19  ;;  %v5132_v19 = vld [vmem:[%s4703_s17 + $0x150] sm:$0xff]  }
  0xa2   : > { %1045 = vmatprep.subr.bf16.mxu0 %v4119_v22  ;;  %3580 = vmatprep.subr.bf16.mxu1 %v4429_v7 }
  0xa5   : > { %1046 = vmatpush1.bf16.msra.mxu0 %v4121_v23  ;;  %3581 = vmatpush3.bf16.msra.mxu1 %v4122_v24  ;;  %v1385_v23 = vunpack.c.0.s8 %v1384_v20  ;;  %v5139_v20 = vld [vmem:[%s4703_s17 + $0x118] sm:$0xff]  }
  0xa6   : > { %1047 = vmatprep.subr.bf16.mxu0 %v4123_v25  ;;  %3582 = vmatprep.subr.bf16.mxu1 %v4429_v7 }
  0xa9   : > { %1048 = vmatpush1.bf16.msra.mxu0 %v4125_v26  ;;  %3583 = vmatpush3.bf16.msra.mxu1 %v4126_v27 }
  0xaa   : > { %3588 = vmatprep.subr.bf16.mxu0 %v4429_v7  ;;  %3608 = vmatprep.subr.bf16.mxu1 %v4429_v7 }
  0xac   : > { %1050 = vmatmul.mubr.bf16.vlgmr.msra.gmra.mrb[0].mxu0 %v4818_v3  ;;  %3585 = vmatmul.mubr.bf16.vlgmr.msra.gmra.mrb[4].mxu1 %v1098_v29  ;;  %v1388_v29 = vsub.s32 %v1385_v23, %v1206_v52  ;;  %v5152_v23 = vld [vmem:[%s4703_s17 + $0x160] sm:$0xff]  }
  0xad   : > { %3604 = vmatprep.mubr.msk.bf16.mxu0 %vm4430_vm0, %v4429_v7  ;;  %3624 = vmatprep.mubr.msk.bf16.mxu1 %vm4430_vm0, %v4429_v7 }
  0xb2   : > { %3589 = vmatpush3.bf16.xpose.msra.mxu0 %v4913_v30  ;;  %3609 = vmatpush3.bf16.xpose.msra.mxu1 %v4916_v31 }
  0xb3   : > { %3590 = vmatprep.subr.bf16.mxu0 %v4429_v7  ;;  %3610 = vmatprep.subr.bf16.mxu1 %v4429_v7 }
  0xba   : > { %3591 = vmatpush3.bf16.xpose.msra.mxu0 %v4923_v32  ;;  %3611 = vmatpush3.bf16.xpose.msra.mxu1 %v4927_v33 }
  0xbb   : > { %3592 = vmatprep.subr.bf16.mxu0 %v4429_v7  ;;  %3612 = vmatprep.subr.bf16.mxu1 %v4429_v7 }
  0xc2   : > { %3593 = vmatpush3.bf16.xpose.msra.mxu0 %v4933_v34  ;;  %3613 = vmatpush3.bf16.xpose.msra.mxu1 %v4937_v35 }
  0xc3   : > { %3594 = vmatprep.subr.bf16.mxu0 %v4429_v7  ;;  %3614 = vmatprep.subr.bf16.mxu1 %v4429_v7 }
  0xca   : > { %3595 = vmatpush3.bf16.xpose.msra.mxu0 %v4943_v36  ;;  %3615 = vmatpush3.bf16.xpose.msra.mxu1 %v4947_v37 }
  0xcb   : > { %3596 = vmatprep.subr.bf16.mxu0 %v4429_v7  ;;  %3616 = vmatprep.subr.bf16.mxu1 %v4429_v7 }
  0xd2   : > { %3597 = vmatpush3.bf16.xpose.msra.mxu0 %v4953_v38  ;;  %3617 = vmatpush3.bf16.xpose.msra.mxu1 %v4957_v39 }
  0xd3   : > { %3598 = vmatprep.subr.bf16.mxu0 %v4429_v7  ;;  %3618 = vmatprep.subr.bf16.mxu1 %v4429_v7 }
  0xda   : > { %3599 = vmatpush3.bf16.xpose.msra.mxu0 %v4963_v40  ;;  %3619 = vmatpush3.bf16.xpose.msra.mxu1 %v4967_v41 }
  0xdb   : > { %3600 = vmatprep.subr.bf16.mxu0 %v4429_v7  ;;  %3620 = vmatprep.subr.bf16.mxu1 %v4429_v7 }
  0xe2   : > { %3601 = vmatpush3.bf16.xpose.msra.mxu0 %v4973_v42  ;;  %3621 = vmatpush3.bf16.xpose.msra.mxu1 %v4977_v43 }
  0xe3   : > { %3602 = vmatprep.subr.bf16.mxu0 %v4429_v7  ;;  %3622 = vmatprep.subr.bf16.mxu1 %v4429_v7 }
  0xea   : > { %3603 = vmatpush3.bf16.xpose.msra.mxu0 %v4983_v44  ;;  %3623 = vmatpush3.bf16.xpose.msra.mxu1 %v4986_v45 }
  0xeb   : > { %3628 = vmatprep.subr.bf16.mxu0 %v4429_v7  ;;  %3648 = vmatprep.subr.bf16.mxu1 %v4429_v7 }
 0x15f   : > { %v3391_v46 = vpop.f32.mrb[0].mxu1 }
 0x160   : > { %v3392_v47 = vpop.f32.mrb[1].mxu1 }
 0x161   : > { %v3393_v48 = vadd.f32 %v3392_v47, %v3391_v46  ;;  %v3394_v49 = vpop.f32.mrb[2].mxu1 }
 0x162   : > { %v3395_v50 = vpop.f32.mrb[3].mxu1 }
 0x17f   : > { %v1051_v57 = vpop.f32.mrb[0].mxu0  ;;  %v1197_v60 = vpop.f32.mrb[4].mxu1 }
 0x180   : > { %v1215_v59 = vadd.f32 %v1208_v56, %v1051_v57  ;;  %v1053_v61 = vpop.f32.mrb[1].mxu0  ;;  %v1229_v62 = vsub.f32 %v3393_v48, %v1197_v60  ;;  %v3586_v0 = vpop.f32.mrb[5].mxu1  ;;  %v1245_v12 = vadd.f32 %v3258_v11, %v1197_v60  ;;  %v5018_v56 = vld [vmem:[%s4703_s17 + $0xc0] sm:$0xff]   ;;  %v5040_v60 = vld [vmem:[%s4703_s17 + $0x90] sm:$0xff]  }
 0x181   : > { %v1055_v63 = vpop.f32.mrb[2].mxu0  ;;  %v1200_v3 = vpop.f32.mrb[6].mxu1  ;;  %v1216_v4 = vadd.f32 %v1212_v58, %v1053_v61  ;;  %v5030_v58 = vld [vmem:[%s4703_s17 + $0x88] sm:$0xff]   ;;  %v5043_v61 = vld [vmem:[%s4703_s17 + $0xd0] sm:$0xff]   ;;  %v5060_v0 = vld [vmem:[%s4703_s17 + $0xa0] sm:$0xff]  }
 0x182   : > { %v3255_v1 = vmul.f32 -1.442695, %v1215_v59  ;;  %v1056_v2 = vpop.f32.mrb[3].mxu0  ;;  %v3587_v5 = vpop.f32.mrb[7].mxu1  ;;  %v1237_v16 = vadd.f32 %v3257_v14, %v1229_v62  ;;  %v5033_v59 = vld [vmem:[%s4703_s17 + $0xc8] sm:$0xff]   ;;  %v5050_v62 = vld [vmem:[%s4703_s17 + $0x98] sm:$0xff]  }
 0x183   : > { %v3256_v6 = vmul.f32 -1.442695, %v1216_v4  ;;  %v5053_v63 = vld [vmem:[%s4703_s17 + $0xd8] sm:$0xff]   ;;  %v5070_v2 = vld [vmem:[%s4703_s17 + $0xa8] sm:$0xff]   ;;  %v5080_v4 = vld [vmem:[%s4703_s17 + $0xb0] sm:$0xff]  }
 0x184   : > { %4191 = vpow2.f32 %v3255_v1  ;;  %v5063_v1 = vld [vmem:[%s4703_s17 + $0xe0] sm:$0xff]   ;;  %v5073_v3 = vld [vmem:[%s4703_s17 + $0xe8] sm:$0xff]   ;;  %v5083_v5 = vld [vmem:[%s4703_s17 + $0xf0] sm:$0xff]  }
 0x185   : > { %4193 = vpow2.f32 %v3256_v6  ;;  %v5090_v6 = vld [vmem:[%s4703_s17 + $0xb8] sm:$0xff]   ;;  %v5107_v14 = vld [vmem:[%s4703_s17 + $0x140] sm:$0xff]  }
 0x18e   : > { %v4192_v8 = vpop.eup %4191 }
 0x18f   : > { %v1223_v9 = vadd.f32 1.0, %v4192_v8  ;;  %v4194_v10 = vpop.eup %4193  ;;  %v5093_v8 = vld [vmem:[%s4703_s17 + $0xf8] sm:$0xff]  }
 0x190   : > { %v1224_v13 = vadd.f32 1.0, %v4194_v10 }
 0x191   : > { %4195 = vrcp.f32 %v1223_v9 }
 0x192   : > { %4197 = vrcp.f32 %v1224_v13 }
 0x19b   : > { %v4196_v15 = vpop.eup %4195 }
 0x19c   : > { %v1246_v17 = vmul.f32 %v4196_v15, %v1245_v12  ;;  %v4198_v21 = vpop.eup %4197  ;;  %v5103_v12 = vld [vmem:[%s4703_s17 + $0x100] sm:$0xff]  }
 0x19d   : > { %v1249_v22 = vsub.f32 1.0, %v4198_v21  ;;  %v1251_v26 = vmul.f32 %v4198_v21, %v4900_v28  ;;  %v5142_v21 = vld [vmem:[%s4703_s17 + $0x158] sm:$0xff]  }
 0x19e   : > { %v1247_v18 = vadd.f32 %v1246_v17, %v1237_v16  ;;  %v5119_v16 = vld [vmem:[%s4703_s17 + $0x108] sm:$0xff]  }
 0x19f   : > { %v5122_v17 = vld [vmem:[%s4703_s17 + $0x148] sm:$0xff]  }
 0x1a0   : > { %4199 = vtanh.f32 %v1247_v18  ;;  %v5129_v18 = vld [vmem:[%s4703_s17 + $0x110] sm:$0xff]  }
 0x1aa   : > { %v4200_v24 = vpop.eup %4199 }
 0x1ab   : > { %v1250_v25 = vmul.f32 %v4200_v24, %v1249_v22  ;;  %v5149_v22 = vld [vmem:[%s4703_s17 + $0x120] sm:$0xff]   ;;  %v5159_v24 = vld [vmem:[%s4703_s17 + $0x128] sm:$0xff]  }
 0x1ad   : > { %v1252_v27 = vadd.f32 %v1251_v26, %v1250_v25  ;;  %v5162_v25 = vld [vmem:[%s4703_s17 + $0x168] sm:$0xff]   ;;  %v5169_v26 = vld [vmem:[%s4703_s17 + $0x130] sm:$0xff]  }
 0x1af   : > { %2584 = vst [vmem:[%s4713_s25] sm:$0xff] %v1252_v27  ;;  %v1381_v46 = vpack.c.bf16 %v1252_v27, %v1252_v27  ;;  %v5172_v27 = vld [vmem:[%s4703_s17 + $0x170] sm:$0xff]  }
 0x1b1   : > { %v1389_v47 = vrot.slane %v1381_v46, %v1388_v29  ;;  %2673 = vst [vmem:[#allocation3] sm:$0xf] %v1381_v46  ;;  %v5181_v46 = vld [vmem:[%s4703_s17 + $0x138] sm:$0xff]  }
 0x1b3   : > { %v5006_v48 = vrot.slane %v1389_v47, %v1388_v29  ;;  %v1390_v49 = vcombine.high %v1389_v47, %v1389_v47  ;;  %v5184_v47 = vld [vmem:[%s4703_s17 + $0x178] sm:$0xff]  }
 0x1b5   : > { %v3259_v50 = vpack.i.b16 %v5006_v48, %v5006_v48  ;;  %v1408_v51 = vunpack.i.h.s16 %v5006_v48  ;;  %v5011_v54 = vrot.slane %v1390_v49, %v1388_v29  ;;  %v1405_v29 = vcombine.high %v5006_v48, %v5006_v48 }
 0x1b7   : > { %v1419_v28 = vrot.slane %v3259_v50, %v4992_v53  ;;  %v1509_v52 = vpack.i.b16 %v1408_v51, %v1408_v51  ;;  %v1410_v9 = vunpack.i.h.s16 %v5011_v54  ;;  %v3276_v10 = vpack.i.b16 %v5011_v54, %v5011_v54 }
 0x1b8   : > { %v1412_v49 = vunpack.i.h.s16 %v1405_v29  ;;  %v3293_v50 = vpack.i.b16 %v1405_v29, %v1405_v29  ;;  %v5230_v29 = vld [vmem:[%s4703_s17 + $0x1d8] sm:$0xff]  }
 0x1b9   : > { %3605 = vmatmul.mubr.bf16.vlgmr.msra.gmra.mrb[4].mxu0 %v1419_v28  ;;  %v1513_v57 = vrot.slane %v1509_v52, %v4992_v53  ;;  %v1697_v11 = vpack.i.b16 %v1410_v9, %v1410_v9  ;;  %v1607_v13 = vrot.slane %v3276_v10, %v4992_v53  ;;  %v5191_v28 = vld [vmem:[%s4703_s17 + $0x180] sm:$0xff]   ;;  %v5207_v9 = vld [vmem:[%s4703_s17 + $0x188] sm:$0xff]   ;;  %5714 = vst [vmem:[#allocation27_spill] sm:$0xff] %v5230_v29 }
 0x1ba   : > { %3629 = vmatpush3.bf16.xpose.msra.mxu0 %v5014_v55  ;;  %3644 = vmatprep.mubr.msk.bf16.mxu0 %vm4430_vm0, %v4429_v7  ;;  %v1885_v51 = vpack.i.b16 %v1412_v49, %v1412_v49  ;;  %v1795_v48 = vrot.slane %v3293_v50, %v4992_v53  ;;  %v5195_v52 = vld [vmem:[%s4703_s17 + $0x1c0] sm:$0xff]   ;;  %v5210_v10 = vld [vmem:[%s4703_s17 + $0x1c8] sm:$0xff]  }
 0x1bb   : > { %3625 = vmatmul.mubr.bf16.vlgmr.msra.gmra.mrb[8].mxu1 %v1513_v57  ;;  %3630 = vmatprep.subr.bf16.mxu0 %v4429_v7  ;;  %v1701_v15 = vrot.slane %v1697_v11, %v4992_v53  ;;  %v5217_v11 = vld [vmem:[%s4703_s17 + $0x190] sm:$0xff]   ;;  %v5237_v49 = vld [vmem:[%s4703_s17 + $0x1a0] sm:$0xff]  }
 0x1bc   : > { %3649 = vmatpush3.bf16.xpose.msra.mxu1 %v5018_v56  ;;  %3664 = vmatprep.mubr.msk.bf16.mxu1 %vm4430_vm0, %v4429_v7  ;;  %v1889_v57 = vrot.slane %v1885_v51, %v4992_v53  ;;  %5715 = vst [vmem:[#allocation28_spill] sm:$0xff] %v5237_v49  ;;  %v5240_v50 = vld [vmem:[%s4703_s17 + $0x1e0] sm:$0xff]   ;;  %v5247_v51 = vld [vmem:[%s4703_s17 + $0x1a8] sm:$0xff]  }
 0x1bd   : > { %3650 = vmatprep.subr.bf16.mxu1 %v4429_v7  ;;  %5716 = vst [vmem:[#allocation29_spill] sm:$0xff] %v5240_v50  ;;  %5717 = vst [vmem:[#allocation30_spill] sm:$0xff] %v5247_v51 }
 0x1c2   : > { %3631 = vmatpush3.bf16.xpose.msra.mxu0 %v5030_v58 }
 0x1c3   : > { %3632 = vmatprep.subr.bf16.mxu0 %v4429_v7 }
 0x1c4   : > { %3651 = vmatpush3.bf16.xpose.msra.mxu1 %v5033_v59 }
 0x1c5   : > { %3652 = vmatprep.subr.bf16.mxu1 %v4429_v7 }
 0x1ca   : > { %3633 = vmatpush3.bf16.xpose.msra.mxu0 %v5040_v60 }
 0x1cb   : > { %3634 = vmatprep.subr.bf16.mxu0 %v4429_v7 }
 0x1cc   : > { %3653 = vmatpush3.bf16.xpose.msra.mxu1 %v5043_v61 }
 0x1cd   : > { %3654 = vmatprep.subr.bf16.mxu1 %v4429_v7 }
 0x1d2   : > { %3635 = vmatpush3.bf16.xpose.msra.mxu0 %v5050_v62 }
 0x1d3   : > { %3636 = vmatprep.subr.bf16.mxu0 %v4429_v7 }
 0x1d4   : > { %3655 = vmatpush3.bf16.xpose.msra.mxu1 %v5053_v63 }
 0x1d5   : > { %3656 = vmatprep.subr.bf16.mxu1 %v4429_v7 }
 0x1da   : > { %3637 = vmatpush3.bf16.xpose.msra.mxu0 %v5060_v0 }
 0x1db   : > { %3638 = vmatprep.subr.bf16.mxu0 %v4429_v7 }
 0x1dc   : > { %3657 = vmatpush3.bf16.xpose.msra.mxu1 %v5063_v1 }
 0x1dd   : > { %3658 = vmatprep.subr.bf16.mxu1 %v4429_v7 }
 0x1e2   : > { %3639 = vmatpush3.bf16.xpose.msra.mxu0 %v5070_v2 }
 0x1e3   : > { %3640 = vmatprep.subr.bf16.mxu0 %v4429_v7 }
 0x1e4   : > { %3659 = vmatpush3.bf16.xpose.msra.mxu1 %v5073_v3 }
 0x1e5   : > { %3660 = vmatprep.subr.bf16.mxu1 %v4429_v7 }
 0x1ea   : > { %3641 = vmatpush3.bf16.xpose.msra.mxu0 %v5080_v4 }
 0x1eb   : > { %3642 = vmatprep.subr.bf16.mxu0 %v4429_v7 }
 0x1ec   : > { %3661 = vmatpush3.bf16.xpose.msra.mxu1 %v5083_v5 }
 0x1ed   : > { %3662 = vmatprep.subr.bf16.mxu1 %v4429_v7 }
 0x1f2   : > { %3643 = vmatpush3.bf16.xpose.msra.mxu0 %v5090_v6 }
 0x1f3   : > { %3668 = vmatprep.subr.bf16.mxu0 %v4429_v7 }
 0x1f4   : > { %3663 = vmatpush3.bf16.xpose.msra.mxu1 %v5093_v8 }
 0x1f5   : > { %3688 = vmatprep.subr.bf16.mxu1 %v4429_v7 }
 0x1f9   : > { %3645 = vmatmul.mubr.bf16.vlgmr.msra.gmra.mrb[8].mxu0 %v1607_v13  ;;  %v5220_v13 = vld [vmem:[%s4703_s17 + $0x1d0] sm:$0xff]  }
 0x1fa   : > { %3669 = vmatpush3.bf16.xpose.msra.mxu0 %v5103_v12  ;;  %3684 = vmatprep.mubr.msk.bf16.mxu0 %vm4430_vm0, %v4429_v7 }
 0x1fb   : > { %3665 = vmatmul.mubr.bf16.vlgmr.msra.gmra.mrb[12].mxu1 %v1701_v15  ;;  %3670 = vmatprep.subr.bf16.mxu0 %v4429_v7  ;;  %v5227_v15 = vld [vmem:[%s4703_s17 + $0x198] sm:$0xff]  }
 0x1fc   : > { %3689 = vmatpush3.bf16.xpose.msra.mxu1 %v5107_v14  ;;  %3704 = vmatprep.mubr.msk.bf16.mxu1 %vm4430_vm0, %v4429_v7  ;;  %5713 = vst [vmem:[#allocation26_spill] sm:$0xff] %v5227_v15 }
 0x1fd   : > { %3690 = vmatprep.subr.bf16.mxu1 %v4429_v7 }
 0x202   : > { %3671 = vmatpush3.bf16.xpose.msra.mxu0 %v5119_v16 }
 0x203   : > { %3672 = vmatprep.subr.bf16.mxu0 %v4429_v7 }
 0x204   : > { %3691 = vmatpush3.bf16.xpose.msra.mxu1 %v5122_v17 }
 0x205   : > { %3692 = vmatprep.subr.bf16.mxu1 %v4429_v7 }
 0x20a   : > { %3673 = vmatpush3.bf16.xpose.msra.mxu0 %v5129_v18 }
 0x20b   : > { %3674 = vmatprep.subr.bf16.mxu0 %v4429_v7 }
 0x20c   : > { %3693 = vmatpush3.bf16.xpose.msra.mxu1 %v5132_v19 }
 0x20d   : > { %3694 = vmatprep.subr.bf16.mxu1 %v4429_v7 }
 0x212   : > { %3675 = vmatpush3.bf16.xpose.msra.mxu0 %v5139_v20 }
 0x213   : > { %3676 = vmatprep.subr.bf16.mxu0 %v4429_v7 }
 0x214   : > { %3695 = vmatpush3.bf16.xpose.msra.mxu1 %v5142_v21 }
 0x215   : > { %3696 = vmatprep.subr.bf16.mxu1 %v4429_v7 }
 0x21a   : > { %3677 = vmatpush3.bf16.xpose.msra.mxu0 %v5149_v22 }
 0x21b   : > { %3678 = vmatprep.subr.bf16.mxu0 %v4429_v7 }
 0x21c   : > { %3697 = vmatpush3.bf16.xpose.msra.mxu1 %v5152_v23 }
 0x21d   : > { %3698 = vmatprep.subr.bf16.mxu1 %v4429_v7 }
 0x222   : > { %3679 = vmatpush3.bf16.xpose.msra.mxu0 %v5159_v24 }
 0x223   : > { %3680 = vmatprep.subr.bf16.mxu0 %v4429_v7 }
 0x224   : > { %3699 = vmatpush3.bf16.xpose.msra.mxu1 %v5162_v25 }
 0x225   : > { %3700 = vmatprep.subr.bf16.mxu1 %v4429_v7 }
 0x22a   : > { %3681 = vmatpush3.bf16.xpose.msra.mxu0 %v5169_v26 }
 0x22b   : > { %3682 = vmatprep.subr.bf16.mxu0 %v4429_v7 }
 0x22c   : > { %3701 = vmatpush3.bf16.xpose.msra.mxu1 %v5172_v27 }
 0x22d   : > { %3702 = vmatprep.subr.bf16.mxu1 %v4429_v7 }
 0x232   : > { %3683 = vmatpush3.bf16.xpose.msra.mxu0 %v5181_v46 }
 0x233   : > { %3708 = vmatprep.subr.bf16.mxu0 %v4429_v7 }
 0x234   : > { %3703 = vmatpush3.bf16.xpose.msra.mxu1 %v5184_v47 }
 0x235   : > { %3728 = vmatprep.subr.bf16.mxu1 %v4429_v7 }
 0x239   : > { %3685 = vmatmul.mubr.bf16.vlgmr.msra.gmra.mrb[12].mxu0 %v1795_v48  ;;  %v5250_v48 = vld [vmem:[%s4703_s17 + $0x1e8] sm:$0xff]  }
 0x23a   : > { %3709 = vmatpush3.bf16.xpose.msra.mxu0 %v5191_v28  ;;  %3724 = vmatprep.mubr.msk.bf16.mxu0 %vm4430_vm0, %v4429_v7  ;;  %5718 = vst [vmem:[#allocation31_spill] sm:$0xff] %v5250_v48 }
 0x23b   : > { %3705 = vmatmul.mubr.bf16.vlgmr.msra.gmra.mrb[16].mxu1 %v1889_v57  ;;  %3710 = vmatprep.subr.bf16.mxu0 %v4429_v7  ;;  %v5257_v57 = vld [vmem:[%s4703_s17 + $0x1b0] sm:$0xff]  }
 0x23c   : > { %3729 = vmatpush3.bf16.xpose.msra.mxu1 %v5195_v52  ;;  %3744 = vmatprep.mubr.msk.bf16.mxu1 %vm4430_vm0, %v4429_v7  ;;  %5719 = vst [vmem:[#allocation32_spill] sm:$0xff] %v5257_v57 }
 0x23d   : > { %3730 = vmatprep.subr.bf16.mxu1 %v4429_v7 }
 0x242   : > { %3711 = vmatpush3.bf16.xpose.msra.mxu0 %v5207_v9 }
 0x243   : > { %3712 = vmatprep.subr.bf16.mxu0 %v4429_v7 }
 0x244   : > { %3731 = vmatpush3.bf16.xpose.msra.mxu1 %v5210_v10 }
 0x245   : > { %3732 = vmatprep.subr.bf16.mxu1 %v4429_v7 }
 0x24a   : > { %3713 = vmatpush3.bf16.xpose.msra.mxu0 %v5217_v11 }
 0x24b   : > { %3714 = vmatprep.subr.bf16.mxu0 %v4429_v7 }
 0x24c   : > { %3733 = vmatpush3.bf16.xpose.msra.mxu1 %v5220_v13 }
 0x24d   : > { %3734 = vmatprep.subr.bf16.mxu1 %v4429_v7 }
 0x252   : > { %3715 = vmatpush3.bf16.xpose.msra.mxu0 %v5227_v15 }
 0x253   : > { %3716 = vmatprep.subr.bf16.mxu0 %v4429_v7 }
 0x254   : > { %3735 = vmatpush3.bf16.xpose.msra.mxu1 %v5230_v29 }
 0x255   : > { %3736 = vmatprep.subr.bf16.mxu1 %v4429_v7 }
 0x25a   : > { %3717 = vmatpush3.bf16.xpose.msra.mxu0 %v5237_v49  ;;  %v5260_v49 = vld [vmem:[%s4703_s17 + $0x1f0] sm:$0xff]  }
 0x25b   : > { %3718 = vmatprep.subr.bf16.mxu0 %v4429_v7  ;;  %5720 = vst [vmem:[#allocation33_spill] sm:$0xff] %v5260_v49 }
 0x25c   : > { %3737 = vmatpush3.bf16.xpose.msra.mxu1 %v5240_v50  ;;  %v5269_v50 = vld [vmem:[%s4703_s17 + $0x1b8] sm:$0xff]  }
 0x25d   : > { %3738 = vmatprep.subr.bf16.mxu1 %v4429_v7 }
 0x262   : > { %3719 = vmatpush3.bf16.xpose.msra.mxu0 %v5247_v51  ;;  %v1406_v51 = vcombine.high %v5011_v54, %v5011_v54 }
 0x263   : > { %3720 = vmatprep.subr.bf16.mxu0 %v4429_v7 }
 0x264   : > { %3739 = vmatpush3.bf16.xpose.msra.mxu1 %v5250_v48  ;;  %v5272_v48 = vld [vmem:[%s4703_s17 + $0x1f8] sm:$0xff]   ;;  %v1414_v29 = vunpack.i.h.s16 %v1406_v51  ;;  %v3310_v15 = vpack.i.b16 %v1406_v51, %v1406_v51 }
 0x265   : > { %3740 = vmatprep.subr.bf16.mxu1 %v4429_v7 }
 0x26a   : > { %3721 = vmatpush3.bf16.xpose.msra.mxu0 %v5257_v57  ;;  %v2073_v57 = vpack.i.b16 %v1414_v29, %v1414_v29 }
 0x26b   : > { %3722 = vmatprep.subr.bf16.mxu0 %v4429_v7 }
 0x26c   : > { %3741 = vmatpush3.bf16.xpose.msra.mxu1 %v5260_v49  ;;  %v1983_v49 = vrot.slane %v3310_v15, %v4992_v53  ;;  %v2077_v54 = vrot.slane %v2073_v57, %v4992_v53 }
 0x26d   : > { %3742 = vmatprep.subr.bf16.mxu1 %v4429_v7 }
 0x272   : > { %3723 = vmatpush3.bf16.xpose.msra.mxu0 %v5269_v50 }
 0x273   : > { %3748 = vmatprep.subr.bf16.mxu0 %v4429_v7 }
 0x274   : > { %3743 = vmatpush3.bf16.xpose.msra.mxu1 %v5272_v48 }
 0x275   : > { %3768 = vmatprep.subr.bf16.mxu1 %v4429_v7 }
 0x279   : > { %3725 = vmatmul.mubr.bf16.vlgmr.msra.gmra.mrb[16].mxu0 %v1983_v49 }
 0x27a   : > { %3749 = vmatpush3.bf16.msra.mxu0 %v4913_v30  ;;  %3764 = vmatprep.mubr.msk.bf16.mxu0 %vm4430_vm0, %v4429_v7 }
 0x27b   : > { %3745 = vmatmul.mubr.bf16.vlgmr.msra.gmra.mrb[20].mxu1 %v2077_v54  ;;  %3750 = vmatprep.subr.bf16.mxu0 %v4429_v7 }
 0x27c   : > { %3769 = vmatpush3.bf16.msra.mxu1 %v4916_v31  ;;  %3784 = vmatprep.mubr.msk.bf16.mxu1 %vm4430_vm0, %v4429_v7 }
 0x27d   : > { %3770 = vmatprep.subr.bf16.mxu1 %v4429_v7 }
 0x27e   : > { %3751 = vmatpush3.bf16.msra.mxu0 %v4923_v32 }
 0x27f   : > { %3752 = vmatprep.subr.bf16.mxu0 %v4429_v7 }
 0x280   : > { %3771 = vmatpush3.bf16.msra.mxu1 %v4927_v33 }
 0x281   : > { %3772 = vmatprep.subr.bf16.mxu1 %v4429_v7 }
 0x282   : > { %3753 = vmatpush3.bf16.msra.mxu0 %v4933_v34 }
 0x283   : > { %3754 = vmatprep.subr.bf16.mxu0 %v4429_v7 }
 0x284   : > { %3773 = vmatpush3.bf16.msra.mxu1 %v4937_v35 }
 0x285   : > { %3774 = vmatprep.subr.bf16.mxu1 %v4429_v7 }
 0x286   : > { %3755 = vmatpush3.bf16.msra.mxu0 %v4943_v36 }
 0x287   : > { %3756 = vmatprep.subr.bf16.mxu0 %v4429_v7 }
 0x288   : > { %3775 = vmatpush3.bf16.msra.mxu1 %v4947_v37 }
 0x289   : > { %3776 = vmatprep.subr.bf16.mxu1 %v4429_v7 }
 0x28a   : > { %3757 = vmatpush3.bf16.msra.mxu0 %v4953_v38 }
 0x28b   : > { %3758 = vmatprep.subr.bf16.mxu0 %v4429_v7 }
 0x28c   : > { %v1503_v30 = vpop.f32.mrb[4].mxu0  ;;  %3777 = vmatpush3.bf16.msra.mxu1 %v4957_v39 }
 0x28d   : > { %v3606_v31 = vpop.f32.mrb[5].mxu0  ;;  %v2168_v32 = vsel %vm2167_vm1, %v1503_v30, -inf  ;;  %3778 = vmatprep.subr.bf16.mxu1 %v4429_v7 }
 0x28e   : > { %2169 = vmax.xlane.f32.xlu0 %v2168_v32  ;;  %v1506_v33 = vpop.f32.mrb[6].mxu0  ;;  %v1597_v34 = vpop.f32.mrb[8].mxu1  ;;  %3759 = vmatpush3.bf16.msra.mxu0 %v4963_v40 }
 0x28f   : > { %v3607_v35 = vpop.f32.mrb[7].mxu0  ;;  %v3626_v36 = vpop.f32.mrb[9].mxu1  ;;  %3760 = vmatprep.subr.bf16.mxu0 %v4429_v7  ;;  %v2171_v39 = vsel %vm2167_vm1, %v1597_v34, -inf }
 0x290   : > { %v1600_v37 = vpop.f32.mrb[10].mxu1  ;;  %3779 = vmatpush3.bf16.msra.mxu1 %v4967_v41 }
 0x291   : > { %v3627_v38 = vpop.f32.mrb[11].mxu1  ;;  %3780 = vmatprep.subr.bf16.mxu1 %v4429_v7 }
 0x292   : > { %2172 = vmax.xlane.f32.xlu0 %v2171_v39  ;;  %3761 = vmatpush3.bf16.msra.mxu0 %v4973_v42 }
 0x293   : > { %3762 = vmatprep.subr.bf16.mxu0 %v4429_v7 }
 0x294   : > { %3781 = vmatpush3.bf16.msra.mxu1 %v4977_v43 }
 0x295   : > { %3782 = vmatprep.subr.bf16.mxu1 %v4429_v7 }
 0x296   : > { %3763 = vmatpush3.bf16.msra.mxu0 %v4983_v44 }
 0x297   : > { %3788 = vmatprep.subr.bf16.mxu0 %v4429_v7 }
 0x298   : > { %3783 = vmatpush3.bf16.msra.mxu1 %v4986_v45 }
 0x299   : > { %3808 = vmatprep.subr.bf16.mxu1 %v4429_v7 }
 0x2cc   : > { %v1691_v40 = vpop.f32.mrb[8].mxu0 }
 0x2cd   : > { %v3646_v41 = vpop.f32.mrb[9].mxu0  ;;  %v2174_v53 = vsel %vm2167_vm1, %v1691_v40, -inf }
 0x2ce   : > { %2175 = vmax.xlane.f32.xlu1 %v2174_v53  ;;  %v1694_v42 = vpop.f32.mrb[10].mxu0  ;;  %v1785_v15 = vpop.f32.mrb[12].mxu1 }
 0x2cf   : > { %v3647_v29 = vpop.f32.mrb[11].mxu0  ;;  %v3666_v49 = vpop.f32.mrb[13].mxu1  ;;  %v2177_v57 = vsel %vm2167_vm1, %v1785_v15, -inf }
 0x2d0   : > { %v1788_v43 = vpop.f32.mrb[14].mxu1 }
 0x2d1   : > { %v3667_v51 = vpop.f32.mrb[15].mxu1 }
 0x2d2   : > { %2178 = vmax.xlane.f32.xlu1 %v2177_v57 }
 0x30c   : > { %v1879_v44 = vpop.f32.mrb[12].mxu0 }
 0x30d   : > { %v3686_v54 = vpop.f32.mrb[13].mxu0  ;;  %v2180_v45 = vsel %vm2167_vm1, %v1879_v44, -inf }
 0x30e   : > { %v1882_v31 = vpop.f32.mrb[14].mxu0  ;;  %2181 = vmax.xlane.f32.xlu0 %v2180_v45  ;;  %v1973_v32 = vpop.f32.mrb[16].mxu1 }
 0x30f   : > { %v3687_v33 = vpop.f32.mrb[15].mxu0  ;;  %v3706_v35 = vpop.f32.mrb[17].mxu1  ;;  %v2183_v36 = vsel %vm2167_vm1, %v1973_v32, -inf }
 0x310   : > { %2184 = vmax.xlane.f32.xlu1 %v2183_v36  ;;  %v1976_v37 = vpop.f32.mrb[18].mxu1 }
 0x311   : > { %v3707_v38 = vpop.f32.mrb[19].mxu1 }
 0x31b   : > { %v2170_v39 = vpop.xlane.xlu0 %2169 }
 0x31c   : > { %v2192_v41 = vsub.f32 %v1503_v30, %v2170_v39 }
 0x31e   : > { %v2200_v53 = vmul.f32 1.442695, %v2192_v41 }
 0x31f   : > { %v2173_v42 = vpop.xlane.xlu0 %2172 }
 0x320   : > { %4201 = vpow2.f32 %v2200_v53  ;;  %v2193_v29 = vsub.f32 %v1597_v34, %v2173_v42 }
 0x322   : > { %v2202_v49 = vmul.f32 1.442695, %v2193_v29 }
 0x324   : > { %4203 = vpow2.f32 %v2202_v49 }
 0x32a   : > { %v4202_v43 = vpop.eup %4201 }
 0x32b   : > { %v2216_v51 = vsel %vm2167_vm1, %v4202_v43, 0.0 }
 0x32c   : > { %2217 = vadd.xlane.f32.xlu0 %v2216_v51 }
 0x32e   : > { %v4204_v57 = vpop.eup %4203 }
 0x32f   : > { %v2219_v54 = vsel %vm2167_vm1, %v4204_v57, 0.0 }
 0x330   : > { %2220 = vadd.xlane.f32.xlu1 %v2219_v54 }
 0x34c   : > { %v5324_v45 = vpop.f32.mrb[16].mxu0 }
 0x34d   : > { %v3726_v31 = vpop.f32.mrb[17].mxu0  ;;  %v2186_v30 = vsel %vm2167_vm1, %v5324_v45, -inf }
 0x34e   : > { %v2070_v33 = vpop.f32.mrb[18].mxu0  ;;  %2187 = vmax.xlane.f32.xlu0 %v2186_v30  ;;  %v5328_v35 = vpop.f32.mrb[20].mxu1 }
 0x34f   : > { %v3727_v34 = vpop.f32.mrb[19].mxu0  ;;  %v3746_v36 = vpop.f32.mrb[21].mxu1  ;;  %v2189_v37 = vsel %vm2167_vm1, %v5328_v35, -inf }
 0x350   : > { %2190 = vmax.xlane.f32.xlu1 %v2189_v37  ;;  %v2164_v38 = vpop.f32.mrb[22].mxu1 }
 0x351   : > { %v3747_v39 = vpop.f32.mrb[23].mxu1 }
 0x35b   : > { %v2176_v41 = vpop.xlane.xlu1 %2175 }
 0x35c   : > { %v2194_v53 = vsub.f32 %v1691_v40, %v2176_v41 }
 0x35e   : > { %v2204_v42 = vmul.f32 1.442695, %v2194_v53 }
 0x35f   : > { %v2179_v29 = vpop.xlane.xlu1 %2178 }
 0x360   : > { %4205 = vpow2.f32 %v2204_v42  ;;  %v2195_v49 = vsub.f32 %v1785_v15, %v2179_v29 }
 0x362   : > { %v2206_v51 = vmul.f32 1.442695, %v2195_v49 }
 0x364   : > { %4207 = vpow2.f32 %v2206_v51 }
 0x36a   : > { %v5332_v54 = vpop.eup %4205 }
 0x36b   : > { %v2222_v31 = vsel %vm2167_vm1, %v5332_v54, 0.0 }
 0x36c   : > { %2223 = vadd.xlane.f32.xlu0 %v2222_v31 }
 0x36e   : > { %v5336_v30 = vpop.eup %4207 }
 0x36f   : > { %v2225_v33 = vsel %vm2167_vm1, %v5336_v30, 0.0 }
 0x370   : > { %2226 = vadd.xlane.f32.xlu1 %v2225_v33 }
 0x39b   : > { %v2182_v34 = vpop.xlane.xlu0 %2181 }
 0x39c   : > { %v2196_v40 = vsub.f32 %v1879_v44, %v2182_v34 }
 0x39d   : > { %v2185_v36 = vpop.xlane.xlu1 %2184 }
 0x39e   : > { %v2208_v37 = vmul.f32 1.442695, %v2196_v40  ;;  %v2197_v38 = vsub.f32 %v1973_v32, %v2185_v36 }
 0x3a0   : > { %4209 = vpow2.f32 %v2208_v37  ;;  %v2210_v15 = vmul.f32 1.442695, %v2197_v38 }
 0x3a2   : > { %4211 = vpow2.f32 %v2210_v15 }
 0x3aa   : > { %v5340_v39 = vpop.eup %4209 }
 0x3ab   : > { %v2228_v41 = vsel %vm2167_vm1, %v5340_v39, 0.0 }
 0x3ac   : > { %v5344_v53 = vpop.eup %4211  ;;  %2229 = vadd.xlane.f32.xlu0 %v2228_v41 }
 0x3ad   : > { %v2231_v42 = vsel %vm2167_vm1, %v5344_v53, 0.0 }
 0x3ae   : > { %2232 = vadd.xlane.f32.xlu1 %v2231_v42 }
 0x3b9   : > { %v2218_v29 = vpop.xlane.xlu0 %2217 }
 0x3ba   : > { %4213 = vrcp.f32 %v2218_v29 }
 0x3bd   : > { %v2221_v44 = vpop.xlane.xlu1 %2220 }
 0x3be   : > { %4215 = vrcp.f32 %v2221_v44 }
 0x3c4   : > { %v4214_v32 = vpop.eup %4213 }
 0x3c5   : > { %v2248_v49 = vmul.f32 %v4214_v32, %v4202_v43 }
 0x3c7   : > { %v2256_v51 = vpack.c.bf16 %v2248_v49, %v2248_v49 }
 0x3c8   : > { %v4216_v31 = vpop.eup %4215 }
 0x3c9   : > { %3765 = vmatmul.mubr.bf16.vlgmr.msra.gmra.mrb[20].mxu0 %v2256_v51  ;;  %v2249_v33 = vmul.f32 %v4216_v31, %v4204_v57 }
 0x3ca   : > { %3789 = vmatpush3.bf16.msra.mxu0 %v5014_v55  ;;  %3804 = vmatprep.mubr.msk.bf16.mxu0 %vm4430_vm0, %v4429_v7 }
 0x3cb   : > { %v2257_v34 = vpack.c.bf16 %v2249_v33, %v2249_v33  ;;  %v2593_v40 = vrot.slane %v2249_v33, 7  ;;  %3790 = vmatprep.subr.bf16.mxu0 %v4429_v7 }
 0x3cd   : > { %3785 = vmatmul.mubr.bf16.vlgmr.msra.gmra.mrb[24].mxu1 %v2257_v34  ;;  %v2595_v36 = vsel %vm2594_vm2, %v2593_v40, %v2248_v49 }
 0x3ce   : > { %3791 = vmatpush3.bf16.msra.mxu0 %v5030_v58  ;;  %3809 = vmatpush3.bf16.msra.mxu1 %v5018_v56 }
 0x3cf   : > { %3792 = vmatprep.subr.bf16.mxu0 %v4429_v7  ;;  %3810 = vmatprep.subr.bf16.mxu1 %v4429_v7 }
 0x3d0   : > { %3824 = vmatprep.mubr.msk.bf16.mxu1 %vm4430_vm0, %v4429_v7 }
 0x3d2   : > { %3793 = vmatpush3.bf16.msra.mxu0 %v5040_v60  ;;  %3811 = vmatpush3.bf16.msra.mxu1 %v5033_v59 }
 0x3d3   : > { %3794 = vmatprep.subr.bf16.mxu0 %v4429_v7  ;;  %3812 = vmatprep.subr.bf16.mxu1 %v4429_v7 }
 0x3d6   : > { %3795 = vmatpush3.bf16.msra.mxu0 %v5050_v62  ;;  %3813 = vmatpush3.bf16.msra.mxu1 %v5043_v61 }
 0x3d7   : > { %3796 = vmatprep.subr.bf16.mxu0 %v4429_v7  ;;  %3814 = vmatprep.subr.bf16.mxu1 %v4429_v7 }
 0x3da   : > { %3797 = vmatpush3.bf16.msra.mxu0 %v5060_v0  ;;  %3815 = vmatpush3.bf16.msra.mxu1 %v5053_v63 }
 0x3db   : > { %v2188_v55 = vpop.xlane.xlu0 %2187  ;;  %3798 = vmatprep.subr.bf16.mxu0 %v4429_v7  ;;  %3816 = vmatprep.subr.bf16.mxu1 %v4429_v7 }
 0x3dc   : > { %v2198_v56 = vsub.f32 %v5324_v45, %v2188_v55 }
 0x3dd   : > { %v2191_v58 = vpop.xlane.xlu1 %2190 }
 0x3de   : > { %v2212_v59 = vmul.f32 1.442695, %v2198_v56  ;;  %v2199_v60 = vsub.f32 %v5328_v35, %v2191_v58  ;;  %3799 = vmatpush3.bf16.msra.mxu0 %v5070_v2  ;;  %3817 = vmatpush3.bf16.msra.mxu1 %v5063_v1 }
 0x3df   : > { %3800 = vmatprep.subr.bf16.mxu0 %v4429_v7  ;;  %3818 = vmatprep.subr.bf16.mxu1 %v4429_v7 }
 0x3e0   : > { %4217 = vpow2.f32 %v2212_v59  ;;  %v2214_v61 = vmul.f32 1.442695, %v2199_v60 }
 0x3e2   : > { %4219 = vpow2.f32 %v2214_v61  ;;  %3801 = vmatpush3.bf16.msra.mxu0 %v5080_v4  ;;  %3819 = vmatpush3.bf16.msra.mxu1 %v5073_v3 }
 0x3e3   : > { %3802 = vmatprep.subr.bf16.mxu0 %v4429_v7  ;;  %3820 = vmatprep.subr.bf16.mxu1 %v4429_v7 }
 0x3e6   : > { %3803 = vmatpush3.bf16.msra.mxu0 %v5090_v6  ;;  %3821 = vmatpush3.bf16.msra.mxu1 %v5083_v5 }
 0x3e7   : > { %3822 = vmatprep.subr.bf16.mxu1 %v4429_v7  ;;  %3828 = vmatprep.subr.bf16.mxu0 %v4429_v7 }
 0x3ea   : > { %v5385_v62 = vpop.eup %4217  ;;  %3823 = vmatpush3.bf16.msra.mxu1 %v5093_v8 }
 0x3eb   : > { %v2234_v63 = vsel %vm2167_vm1, %v5385_v62, 0.0  ;;  %3848 = vmatprep.subr.bf16.mxu1 %v4429_v7 }
 0x3ec   : > { %v5391_v0 = vpop.eup %4219  ;;  %2235 = vadd.xlane.f32.xlu0 %v2234_v63 }
 0x3ed   : > { %v2237_v1 = vsel %vm2167_vm1, %v5391_v0, 0.0 }
 0x3ee   : > { %2238 = vadd.xlane.f32.xlu1 %v2237_v1 }
 0x3f9   : > { %v2224_v2 = vpop.xlane.xlu0 %2223 }
 0x3fa   : > { %4221 = vrcp.f32 %v2224_v2 }
 0x3fd   : > { %v2227_v3 = vpop.xlane.xlu1 %2226 }
 0x3fe   : > { %4223 = vrcp.f32 %v2227_v3 }
 0x404   : > { %v4222_v4 = vpop.eup %4221 }
 0x405   : > { %v2250_v5 = vmul.f32 %v4222_v4, %v5332_v54 }
 0x407   : > { %v2258_v6 = vpack.c.bf16 %v2250_v5, %v2250_v5  ;;  %v2596_v8 = vrot.slane %v2250_v5, 6 }
 0x408   : > { %v4224_v43 = vpop.eup %4223 }
 0x409   : > { %3805 = vmatmul.mubr.bf16.vlgmr.msra.gmra.mrb[24].mxu0 %v2258_v6  ;;  %v2251_v57 = vmul.f32 %v4224_v43, %v5336_v30  ;;  %v2598_v45 = vsel %vm2597_vm3, %v2596_v8, %v2595_v36 }
 0x40a   : > { %3829 = vmatpush3.bf16.msra.mxu0 %v5103_v12  ;;  %3844 = vmatprep.mubr.msk.bf16.mxu0 %vm4430_vm0, %v4429_v7 }
 0x40b   : > { %v2259_v35 = vpack.c.bf16 %v2251_v57, %v2251_v57  ;;  %v2599_v37 = vrot.slane %v2251_v57, 5  ;;  %3830 = vmatprep.subr.bf16.mxu0 %v4429_v7 }
 0x40d   : > { %3825 = vmatmul.mubr.bf16.vlgmr.msra.gmra.mrb[28].mxu1 %v2259_v35  ;;  %v2601_v54 = vsel %vm2600_vm4, %v2599_v37, %v2598_v45 }
 0x40e   : > { %3849 = vmatpush3.bf16.msra.mxu1 %v5107_v14  ;;  %3831 = vmatpush3.bf16.msra.mxu0 %v5119_v16 }
 0x40f   : > { %3850 = vmatprep.subr.bf16.mxu1 %v4429_v7  ;;  %3832 = vmatprep.subr.bf16.mxu0 %v4429_v7 }
 0x410   : > { %3864 = vmatprep.mubr.msk.bf16.mxu1 %vm4430_vm0, %v4429_v7 }
 0x412   : > { %3851 = vmatpush3.bf16.msra.mxu1 %v5122_v17  ;;  %3833 = vmatpush3.bf16.msra.mxu0 %v5129_v18 }
 0x413   : > { %3852 = vmatprep.subr.bf16.mxu1 %v4429_v7  ;;  %3834 = vmatprep.subr.bf16.mxu0 %v4429_v7 }
 0x416   : > { %3853 = vmatpush3.bf16.msra.mxu1 %v5132_v19  ;;  %3835 = vmatpush3.bf16.msra.mxu0 %v5139_v20 }
 0x417   : > { %3854 = vmatprep.subr.bf16.mxu1 %v4429_v7  ;;  %3836 = vmatprep.subr.bf16.mxu0 %v4429_v7 }
 0x41a   : > { %3855 = vmatpush3.bf16.msra.mxu1 %v5142_v21  ;;  %3837 = vmatpush3.bf16.msra.mxu0 %v5149_v22 }
 0x41b   : > { %3856 = vmatprep.subr.bf16.mxu1 %v4429_v7  ;;  %3838 = vmatprep.subr.bf16.mxu0 %v4429_v7 }
 0x41e   : > { %3857 = vmatpush3.bf16.msra.mxu1 %v5152_v23  ;;  %3839 = vmatpush3.bf16.msra.mxu0 %v5159_v24  ;;  %v5721_v24 = vld [vmem:[#allocation26_spill] sm:$0xff] }
 0x41f   : > { %3858 = vmatprep.subr.bf16.mxu1 %v4429_v7  ;;  %3840 = vmatprep.subr.bf16.mxu0 %v4429_v7 }
 0x422   : > { %3859 = vmatpush3.bf16.msra.mxu1 %v5162_v25  ;;  %3841 = vmatpush3.bf16.msra.mxu0 %v5169_v26  ;;  %v5722_v25 = vld [vmem:[#allocation27_spill] sm:$0xff]  ;;  %v5723_v26 = vld [vmem:[#allocation28_spill] sm:$0xff] }
 0x423   : > { %3860 = vmatprep.subr.bf16.mxu1 %v4429_v7  ;;  %3842 = vmatprep.subr.bf16.mxu0 %v4429_v7 }
 0x426   : > { %3861 = vmatpush3.bf16.msra.mxu1 %v5172_v27  ;;  %3843 = vmatpush3.bf16.msra.mxu0 %v5181_v46  ;;  %v5724_v27 = vld [vmem:[#allocation29_spill] sm:$0xff]  ;;  %v5725_v46 = vld [vmem:[#allocation30_spill] sm:$0xff] }
 0x427   : > { %3862 = vmatprep.subr.bf16.mxu1 %v4429_v7  ;;  %3868 = vmatprep.subr.bf16.mxu0 %v4429_v7 }
 0x42a   : > { %3863 = vmatpush3.bf16.msra.mxu1 %v5184_v47  ;;  %v5726_v47 = vld [vmem:[#allocation31_spill] sm:$0xff] }
 0x42b   : > { %3888 = vmatprep.subr.bf16.mxu1 %v4429_v7 }
 0x439   : > { %v2230_v12 = vpop.xlane.xlu0 %2229 }
 0x43a   : > { %4225 = vrcp.f32 %v2230_v12 }
 0x43b   : > { %v2233_v14 = vpop.xlane.xlu1 %2232 }
 0x43c   : > { %4227 = vrcp.f32 %v2233_v14 }
 0x444   : > { %v4226_v16 = vpop.eup %4225 }
 0x445   : > { %v2252_v17 = vmul.f32 %v4226_v16, %v5340_v39 }
 0x446   : > { %v4228_v18 = vpop.eup %4227 }
 0x447   : > { %v2260_v19 = vpack.c.bf16 %v2252_v17, %v2252_v17  ;;  %v2602_v20 = vrot.slane %v2252_v17, 4  ;;  %v2253_v21 = vmul.f32 %v4228_v18, %v5344_v53 }
 0x449   : > { %3845 = vmatmul.mubr.bf16.vlgmr.msra.gmra.mrb[28].mxu0 %v2260_v19  ;;  %v2261_v22 = vpack.c.bf16 %v2253_v21, %v2253_v21  ;;  %v2604_v23 = vsel %vm2603_vm5, %v2602_v20, %v2601_v54  ;;  %v4432_v54 = vmov -inf  }
 0x44a   : > { %3869 = vmatpush3.bf16.msra.mxu0 %v5191_v28  ;;  %3884 = vmatprep.mubr.msk.bf16.mxu0 %vm4430_vm0, %v4429_v7  ;;  %v5727_v28 = vld [vmem:[#allocation32_spill] sm:$0xff]  ;;  %2675 = vst.msk [vmem:[#allocation4] sm:$0xff] %vm2674_vm9, %v4432_v54 }
 0x44b   : > { %3865 = vmatmul.mubr.bf16.vlgmr.msra.gmra.mrb[32].mxu1 %v2261_v22  ;;  %3870 = vmatprep.subr.bf16.mxu0 %v4429_v7 }
 0x44c   : > { %3889 = vmatpush3.bf16.msra.mxu1 %v5195_v52  ;;  %3904 = vmatprep.mubr.msk.bf16.mxu1 %vm4430_vm0, %v4429_v7  ;;  %v5728_v52 = vld [vmem:[#allocation33_spill] sm:$0xff] }
 0x44d   : > { %3890 = vmatprep.subr.bf16.mxu1 %v4429_v7 }
 0x44e   : > { %3871 = vmatpush3.bf16.msra.mxu0 %v5207_v9 }
 0x44f   : > { %3872 = vmatprep.subr.bf16.mxu0 %v4429_v7 }
 0x450   : > { %3891 = vmatpush3.bf16.msra.mxu1 %v5210_v10 }
 0x451   : > { %3892 = vmatprep.subr.bf16.mxu1 %v4429_v7 }
 0x452   : > { %3873 = vmatpush3.bf16.msra.mxu0 %v5217_v11 }
 0x453   : > { %3874 = vmatprep.subr.bf16.mxu0 %v4429_v7 }
 0x454   : > { %3893 = vmatpush3.bf16.msra.mxu1 %v5220_v13  ;;  %v2605_v13 = vrot.slane %v2253_v21, 3 }
 0x455   : > { %3894 = vmatprep.subr.bf16.mxu1 %v4429_v7 }
 0x456   : > { %3875 = vmatpush3.bf16.msra.mxu0 %v5721_v24 }
 0x457   : > { %3876 = vmatprep.subr.bf16.mxu0 %v4429_v7 }
 0x458   : > { %3895 = vmatpush3.bf16.msra.mxu1 %v5722_v25 }
 0x459   : > { %3896 = vmatprep.subr.bf16.mxu1 %v4429_v7 }
 0x45a   : > { %3877 = vmatpush3.bf16.msra.mxu0 %v5723_v26 }
 0x45b   : > { %3878 = vmatprep.subr.bf16.mxu0 %v4429_v7 }
 0x45c   : > { %3897 = vmatpush3.bf16.msra.mxu1 %v5724_v27 }
 0x45d   : > { %3898 = vmatprep.subr.bf16.mxu1 %v4429_v7 }
 0x45e   : > { %3879 = vmatpush3.bf16.msra.mxu0 %v5725_v46 }
 0x45f   : > { %3880 = vmatprep.subr.bf16.mxu0 %v4429_v7 }
 0x460   : > { %3899 = vmatpush3.bf16.msra.mxu1 %v5726_v47 }
 0x461   : > { %3900 = vmatprep.subr.bf16.mxu1 %v4429_v7 }
 0x462   : > { %3881 = vmatpush3.bf16.msra.mxu0 %v5727_v28 }
 0x463   : > { %3882 = vmatprep.subr.bf16.mxu0 %v4429_v7 }
 0x464   : > { %3901 = vmatpush3.bf16.msra.mxu1 %v5728_v52 }
 0x465   : > { %3902 = vmatprep.subr.bf16.mxu1 %v4429_v7 }
 0x466   : > { %3883 = vmatpush3.bf16.msra.mxu0 %v5269_v50  ;;  %v2607_v50 = vsel %vm2606_vm6, %v2605_v13, %v2604_v23 }
 0x468   : > { %3903 = vmatpush3.bf16.msra.mxu1 %v5272_v48 }
 0x479   : > { %v2236_v9 = vpop.xlane.xlu0 %2235 }
 0x47a   : > { %4229 = vrcp.f32 %v2236_v9 }
 0x47b   : > { %v2239_v10 = vpop.xlane.xlu1 %2238 }
 0x47c   : > { %4231 = vrcp.f32 %v2239_v10 }
 0x484   : > { %v4230_v11 = vpop.eup %4229 }
 0x485   : > { %v2254_v30 = vmul.f32 %v4230_v11, %v5385_v62 }
 0x486   : > { %v4232_v38 = vpop.eup %4231 }
 0x487   : > { %v2262_v15 = vpack.c.bf16 %v2254_v30, %v2254_v30  ;;  %v2608_v39 = vrot.slane %v2254_v30, 2  ;;  %v2255_v41 = vmul.f32 %v4232_v38, %v5391_v0 }
 0x489   : > { %3885 = vmatmul.mubr.bf16.vlgmr.msra.gmra.mrb[32].mxu0 %v2262_v15  ;;  %v2263_v48 = vpack.c.bf16 %v2255_v41, %v2255_v41  ;;  %v2611_v53 = vrot.slane %v2255_v41, 1  ;;  %v2610_v42 = vsel %vm2609_vm7, %v2608_v39, %v2607_v50 }
 0x48b   : > { %3905 = vmatmul.mubr.bf16.vlgmr.msra.gmra.mrb[36].mxu1 %v2263_v48  ;;  %v2613_v29 = vsel %vm2612_vm8, %v2611_v53, %v2610_v42 }
 0x48c   : > { %2615 = vst [vmem:[%s4715_s19] sm:$0xff] %v2613_v29 }
 0x49c   : > { %v2298_v44 = vpop.f32.mrb[20].mxu0 }
 0x49d   : > { %v3766_v32 = vpop.f32.mrb[21].mxu0  ;;  %v3366_v33 = vpack.c.bf16 %v2298_v44, %v2298_v44 }
 0x49e   : > { %v2301_v49 = vpop.f32.mrb[22].mxu0 }
 0x49f   : > { %v3767_v51 = vpop.f32.mrb[23].mxu0  ;;  %v2648_v58 = vunpack.c.l.b16 %v3366_v33 }
 0x4a0   : > { %v2338_v31 = vpop.f32.mrb[24].mxu1 }
 0x4a1   : > { %v3367_v34 = vpack.c.bf16 %v2338_v31, %v2338_v31  ;;  %v3786_v40 = vpop.f32.mrb[25].mxu1 }
 0x4a2   : > { %v2341_v36 = vpop.f32.mrb[26].mxu1 }
 0x4a3   : > { %v2649_v55 = vunpack.c.l.b16 %v3367_v34  ;;  %v3787_v56 = vpop.f32.mrb[27].mxu1 }
 0x4a5   : > { %v2656_v59 = vrot.slane %v2649_v55, 7 }
 0x4a7   : > { %v2657_v60 = vsel %vm2594_vm2, %v2656_v59, %v2648_v58 }
 0x4dc   : > { %v2378_v61 = vpop.f32.mrb[24].mxu0 }
 0x4dd   : > { %v3368_v62 = vpack.c.bf16 %v2378_v61, %v2378_v61  ;;  %v3806_v63 = vpop.f32.mrb[25].mxu0 }
 0x4de   : > { %v2381_v0 = vpop.f32.mrb[26].mxu0 }
 0x4df   : > { %v2650_v1 = vunpack.c.l.b16 %v3368_v62  ;;  %v3807_v2 = vpop.f32.mrb[27].mxu0 }
 0x4e0   : > { %v2418_v3 = vpop.f32.mrb[28].mxu1 }
 0x4e1   : > { %v2658_v4 = vrot.slane %v2650_v1, 6  ;;  %v3369_v5 = vpack.c.bf16 %v2418_v3, %v2418_v3  ;;  %v3826_v6 = vpop.f32.mrb[29].mxu1 }
 0x4e2   : > { %v2421_v8 = vpop.f32.mrb[30].mxu1 }
 0x4e3   : > { %v2659_v43 = vsel %vm2597_vm3, %v2658_v4, %v2657_v60  ;;  %v2651_v57 = vunpack.c.l.b16 %v3369_v5  ;;  %v3827_v45 = vpop.f32.mrb[31].mxu1 }
 0x4e5   : > { %v2660_v35 = vrot.slane %v2651_v57, 5 }
 0x4e7   : > { %v2661_v37 = vsel %vm2600_vm4, %v2660_v35, %v2659_v43 }
 0x51c   : > { %v2458_v12 = vpop.f32.mrb[28].mxu0 }
 0x51d   : > { %v3370_v14 = vpack.c.bf16 %v2458_v12, %v2458_v12  ;;  %v3846_v16 = vpop.f32.mrb[29].mxu0 }
 0x51e   : > { %v2461_v17 = vpop.f32.mrb[30].mxu0  ;;  %v2498_v18 = vpop.f32.mrb[32].mxu1 }
 0x51f   : > { %v2652_v19 = vunpack.c.l.b16 %v3370_v14  ;;  %v3371_v20 = vpack.c.bf16 %v2498_v18, %v2498_v18  ;;  %v3847_v21 = vpop.f32.mrb[31].mxu0  ;;  %v3866_v22 = vpop.f32.mrb[33].mxu1 }
 0x520   : > { %v2501_v23 = vpop.f32.mrb[34].mxu1 }
 0x521   : > { %v2662_v24 = vrot.slane %v2652_v19, 4  ;;  %v2653_v25 = vunpack.c.l.b16 %v3371_v20  ;;  %v3867_v26 = vpop.f32.mrb[35].mxu1 }
 0x523   : > { %v2663_v27 = vsel %vm2603_vm5, %v2662_v24, %v2661_v37  ;;  %v2664_v46 = vrot.slane %v2653_v25, 3 }
 0x525   : > { %v2665_v47 = vsel %vm2606_vm6, %v2664_v46, %v2663_v27 }
 0x55c   : > { %v2538_v28 = vpop.f32.mrb[32].mxu0 }
 0x55d   : > { %v3372_v7 = vpack.c.bf16 %v2538_v28, %v2538_v28  ;;  %v3886_v52 = vpop.f32.mrb[33].mxu0 }
 0x55e   : > { %v2541_v9 = vpop.f32.mrb[34].mxu0  ;;  %v2578_v10 = vpop.f32.mrb[36].mxu1 }
 0x55f   : > { %v2654_v11 = vunpack.c.l.b16 %v3372_v7  ;;  %v3373_v13 = vpack.c.bf16 %v2578_v10, %v2578_v10  ;;  %v3887_v30 = vpop.f32.mrb[35].mxu0  ;;  %v3906_v38 = vpop.f32.mrb[37].mxu1 }
 0x560   : > { %v2581_v15 = vpop.f32.mrb[38].mxu1 }
 0x561   : > { %v2666_v39 = vrot.slane %v2654_v11, 2  ;;  %v2655_v41 = vunpack.c.l.b16 %v3373_v13  ;;  %v3907_v50 = vpop.f32.mrb[39].mxu1 }
 0x563   : > { %v2667_v48 = vsel %vm2609_vm7, %v2666_v39, %v2665_v47  ;;  %v2668_v53 = vrot.slane %v2655_v41, 1 }
 0x565   : > { %v2669_v42 = vsel %vm2612_vm8, %v2668_v53, %v2667_v48 }
 0x566   : > { %v2670_v29 = vpack.c.b16 %v2669_v42, %v2669_v42 }
 0x568   : > { %2672 = vst [vmem:[#allocation2] sm:$0xf] %v2670_v29 }
 0x569 PF: > { %v4234_v44 = vld [vmem:[%s4709_s28 + $0x40] sm:$0xff]   ;;  %v4433_v32 = vmov 0.0   ;;  %v4236_v51 = vld [vmem:[%s4709_s28 + $0x48] sm:$0xff]   ;;  %vm4434_vm10 = vmmov 0   ;;  %v4238_v33 = vld [vmem:[%s4709_s28 + $0x50] sm:$0xff]   ;;  %s3352_s17 = sshll.u32 %s4411_s26, 7 }
 0x56a   : > { %3908 = vmatprep.subr.bf16.mxu0 %v4433_v32  ;;  %3928 = vmatprep.subr.bf16.mxu1 %v4433_v32  ;;  %v4235_v49 = vld [vmem:[%s4709_s28] sm:$0xff]   ;;  %v4237_v31 = vld [vmem:[%s4709_s28 + $0x8] sm:$0xff]   ;;  %v4239_v34 = vld [vmem:[%s4709_s28 + $0x10] sm:$0xff]   ;;  %s2896_s22 = sshra.s32 %s3352_s17, 7  ;;  %v4435_v54 = vmov 0   ;;  %vm2921_vm11 = vcmask 7168  }
 0x56b   : > { %3909 = vmatpush3.bf16.msra.mxu0 %v4234_v44  ;;  %3924 = vmatprep.mubr.msk.bf16.mxu0 %vm4434_vm10, %v4433_v32  ;;  %v4240_v40 = vld [vmem:[%s4709_s28 + $0x58] sm:$0xff]   ;;  %v4242_v55 = vld [vmem:[%s4709_s28 + $0x60] sm:$0xff]   ;;  %v4244_v58 = vld [vmem:[%s4709_s28 + $0x68] sm:$0xff]   ;;  %s3353_s23 = sshll.u32 %s2896_s22, 3  ;;  %p3354_p7 = scmp.ne.s32.totalorder %s4411_s26, 1 }
 0x56c   : > { %3929 = vmatpush3.bf16.msra.mxu1 %v4235_v49  ;;  %3910 = vmatprep.subr.bf16.mxu0 %v4433_v32  ;;  %v4241_v36 = vld [vmem:[%s4709_s28 + $0x18] sm:$0xff]   ;;  %v4243_v56 = vld [vmem:[%s4709_s28 + $0x20] sm:$0xff]   ;;  %v4245_v59 = vld [vmem:[%s4709_s28 + $0x28] sm:$0xff]   ;;  %v4436_v47 = vmov (!%p3354_p7), 0  }
 0x56d   : > { %3930 = vmatprep.subr.bf16.mxu1 %v4433_v32  ;;  %3944 = vmatprep.mubr.msk.bf16.mxu1 %vm4434_vm10, %v4433_v32  ;;  %v4246_v60 = vld [vmem:[%s4709_s28 + $0x70] sm:$0xff]   ;;  %v4248_v62 = vld [vmem:[%s4709_s28 + $0x78] sm:$0xff]   ;;  %v2694_v0 = vld [vmem:[#allocation3] sm:$0xf] }
 0x56e   : > { %v4247_v61 = vld [vmem:[%s4709_s28 + $0x30] sm:$0xff]   ;;  %v4249_v63 = vld [vmem:[%s4709_s28 + $0x38] sm:$0xff]   ;;  %v3351_v4 = vld [vmem:[%s682_s8] ss:$0 sm:$0xff]  ;;  %s2899_s28 = scalar_lea.vmem %s4711_s0, %s3353_s23 [#allocation7]  ;;  %4233 = vset.pattern.permute.xlu0 %v4435_v54 }
 0x56f   : > { %3911 = vmatpush3.bf16.msra.mxu0 %v4236_v51  ;;  %v2677_v1 = vld [vmem:[#allocation2] sm:$0xf]  ;;  %v2903_v12 = vld [vmem:[#allocation4] sm:$0xff]  ;;  %v2905_v24 = vld [vmem:[#allocation5] sm:$0xff] }
 0x570   : > { %3931 = vmatpush3.bf16.msra.mxu1 %v4237_v31  ;;  %3912 = vmatprep.subr.bf16.mxu0 %v4433_v32 }
 0x571   : > { %3932 = vmatprep.subr.bf16.mxu1 %v4433_v32 }
 0x573   : > { %3913 = vmatpush3.bf16.msra.mxu0 %v4238_v33 }
 0x574   : > { %3933 = vmatpush3.bf16.msra.mxu1 %v4239_v34  ;;  %3914 = vmatprep.subr.bf16.mxu0 %v4433_v32 }
 0x575   : > { %3934 = vmatprep.subr.bf16.mxu1 %v4433_v32 }
 0x577   : > { %3915 = vmatpush3.bf16.msra.mxu0 %v4240_v40 }
 0x578   : > { %3935 = vmatpush3.bf16.msra.mxu1 %v4241_v36  ;;  %3916 = vmatprep.subr.bf16.mxu0 %v4433_v32 }
 0x579   : > { %3936 = vmatprep.subr.bf16.mxu1 %v4433_v32 }
 0x57b   : > { %3917 = vmatpush3.bf16.msra.mxu0 %v4242_v55 }
 0x57c   : > { %3937 = vmatpush3.bf16.msra.mxu1 %v4243_v56  ;;  %3918 = vmatprep.subr.bf16.mxu0 %v4433_v32 }
 0x57d   : > { %3938 = vmatprep.subr.bf16.mxu1 %v4433_v32 }
 0x57f   : > { %3919 = vmatpush3.bf16.msra.mxu0 %v4244_v58 }
 0x580   : > { %3939 = vmatpush3.bf16.msra.mxu1 %v4245_v59  ;;  %3920 = vmatprep.subr.bf16.mxu0 %v4433_v32 }
 0x581   : > { %3940 = vmatprep.subr.bf16.mxu1 %v4433_v32 }
 0x583   : > { %3921 = vmatpush3.bf16.msra.mxu0 %v4246_v60 }
 0x584   : > { %3941 = vmatpush3.bf16.msra.mxu1 %v4247_v61  ;;  %3922 = vmatprep.subr.bf16.mxu0 %v4433_v32 }
 0x585   : > { %3942 = vmatprep.subr.bf16.mxu1 %v4433_v32 }
 0x587   : > { %3923 = vmatpush3.bf16.msra.mxu0 %v4248_v62 }
 0x588   : > { %3943 = vmatpush3.bf16.msra.mxu1 %v4249_v63 }
 0x58a   : > { %3925 = vmatmul.mubr.bf16.vlgmr.msra.gmra.mrb[0].mxu0 %v2694_v0 }
 0x58b   : > { %3945 = vmatmul.mubr.bf16.vlgmr.msra.gmra.mrb[0].mxu1 %v2677_v1 }
 0x65d   : > { %v2793_v2 = vpop.f32.mrb[0].mxu0 }
 0x65e   : > { %v2881_v3 = vpop.f32.mrb[0].mxu1  ;;  %v3926_v5 = vpop.f32.mrb[1].mxu0 }
 0x65f   : > { %v2882_v6 = vadd.f32 %v2881_v3, %v2793_v2  ;;  %v3946_v8 = vpop.f32.mrb[1].mxu1  ;;  %v2796_v43 = vpop.f32.mrb[2].mxu0 }
 0x660   : > { %v2884_v57 = vpop.f32.mrb[2].mxu1  ;;  %v3927_v45 = vpop.f32.mrb[3].mxu0 }
 0x661   : > { %v2894_v35 = vadd.f32 %v3351_v4, %v2882_v6  ;;  %v3947_v37 = vpop.f32.mrb[3].mxu1 }
 0x663   : > { %2900 = vst [vmem:[%s2899_s28] sm:$0xff] %v2894_v35  ;;  %2901 = vmax.xlane.f32.xlu0 %v2894_v35 }
 0x66a   : > { %v2933_v10 = vld [vmem:[%s4711_s0] sm:$0xff] (!%p3354_p7)  ;;  %v2934_v11 = vld [vmem:[%s4711_s0 + $0x8] sm:$0xff] (!%p3354_p7) }
 0x6f0   : > { %v2902_v14 = vpop.xlane.xlu0 %2901 }
 0x6f1   : > { %v2904_v16 = vmax.f32 %v2903_v12, %v2902_v14 }
 0x6f3   : > { %v2906_v17 = vsub.f32 %v2903_v12, %v2904_v16  ;;  %2923 = vst.msk [vmem:[#allocation4] sm:$0xff] %vm2921_vm11, %v2904_v16  ;;  %2912 = vperm.xlu0 %4233, %v2904_v16  }
 0x6f5   : > { %v2907_v22 = vmul.f32 1.442695, %v2906_v17 }
 0x6f7   : > { %4254 = vset.pattern.permute.xlu0 (!%p3354_p7), %v4436_v47 }
 0x6fa   : > { %v2928_v7 = vld [vmem:[#allocation4] sm:$0xff] (!%p3354_p7) }
 0x772   : > { %v2913_v18 = vpop.permute.xlu0 %2912 }
 0x773   : > { %v2915_v19 = vsub.f32 %v2894_v35, %v2913_v18 }
 0x775   : > { %v2916_v20 = vmul.f32 1.442695, %v2915_v19 }
 0x777   : > { %4250 = vpow2.f32 %v2916_v20 }
 0x778   : > { %4252 = vpow2.f32 %v2907_v22 }
 0x781   : > { %v4251_v21 = vpop.eup %4250 }
 0x782   : > { %2918 = vadd.xlane.f32.xlu1 %v4251_v21  ;;  %v4253_v23 = vpop.eup %4252 }
 0x783   : > { %v2909_v25 = vmul.f32 %v4253_v23, %v2905_v24 }
 0x80c   : > { %2927 = sbr.rel (%p3354_p7) target bundleno = 2220 (0x8ac), region = 109 }
 0x80f   : > { %v2919_v26 = vpop.xlane.xlu1 %2918 }
 0x810   : > { %v2920_v27 = vadd.f32 %v2919_v26, %v2909_v25 }
 0x812   : > { %2922 = vst.msk [vmem:[#allocation5] sm:$0xff] %vm2921_vm11, %v2920_v27 }
 0x819   : > { %v2929_v46 = vld [vmem:[#allocation5] sm:$0xff] }
 0x81a   : > { %4255 = vlog2.f32 %v2929_v46 }
 0x824   : > { %v4256_v28 = vpop.eup %4255 }
 0x825   : > { %v2931_v52 = vmul.f32 0.6931472, %v4256_v28 }
 0x827   : > { %v2932_v9 = vadd.f32 %v2931_v52, %v2928_v7 }
 0x829   : > { %2937 = vperm.xlu0 %4254, %v2932_v9  }
 0x8a8   : > { %v2938_v13 = vpop.permute.xlu0 %2937 }
 0x8a9   : > { %v2940_v30 = vsub.f32 %v2933_v10, %v2938_v13  ;;  %v2941_v38 = vsub.f32 %v2934_v11, %v2938_v13 }
 0x8ab   : > { %2942 = vst [vmem:[%s4711_s0] sm:$0xff] %v2940_v30  ;;  %2943 = vst [vmem:[%s4711_s0 + $0x8] sm:$0xff] %v2941_v38 }
 0x8ac PF: > { %s5729_s26 = sadd.s32 4294967295, %s4427_s30   ;;  %s3360_s8 = sshll.u32 %s4415_s27, 7 }
 0x8ad   : > { %s5518_s29 = sand.u32 1, %s5729_s26   ;;  %s5730_s11 = sld [smem:[#allocation39_spill]] }
 0x8ae   : > { %s2982_s12 = sshll.u32 %s4713_s25, 4  ;;  %s3374_s13 = sshll.u32 %s4415_s27, 8  ;;  %s5529_s12 = int_to_ptr.vmem [resolvable:$true] %s2982_s12 }
 0x8af   : > { %s2950_s10 = scalar_lea.sflag [#allocation10], %s5518_s29  ;;  %s4257_s24 = scalar_lea.vmem %s5529_s12, 128 }
 0x8b0   : > { %p4258_p8 = scmp.ne.s32.totalorder %s5529_s12, %s4257_s24  ;;  %s4437_s17 = smov [#allocation9]  }
 0x8b1   : > { %s4261_s22 = sshll.u32 %s4437_s17, 4  ;;  %s4262_s22 = int_to_ptr.vmem [resolvable:$false] %s4261_s22 }
 0x8b2   : > { %p4259_p9 = pnand %p4258_p8, %p4586_p10  ;;  %s4263_s23 = scalar_lea.vmem %s4262_s22, 256 }
 0x8b3   : > { %s5526_s20 = scalar_lea.hbm %s5730_s11, %s3360_s8  ;;  %p4264_p13 = scmp.lt.s32.totalorder %s5529_s12, %s4262_s22 }
 0x8b4   : > { %p4260_p11 = pneg %p4259_p9  ;;  %p4265_p0 = scmp.lt.s32.totalorder %s4263_s23, %s4257_s24 }
 0x8b6   : > { %p4266_p1 = por %p4265_p0, %p4264_p13 }
 0x8b8   : > { %p4267_p2 = pnand %p4266_p1, %p4260_p11 }
 0x8ba   : > { %4270 = shalt.err (!%p4267_p2)
}
 0x8bb   : > { %s4271_s25 = scalar_lea.hbm %s5526_s20, 128  ;;  %s4275_s28 = scalar_lea.hbm %s5730_s11, 256 }
 0x8bc   : > { %p4272_p3 = scmp.ne.s32.totalorder %s5526_s20, %s4271_s25  ;;  %p4276_p6 = scmp.lt.u32.totalorder %s5526_s20, %s5730_s11 }
 0x8bd   : > { %p4277_p7 = scmp.lt.u32.totalorder %s4275_s28, %s4271_s25  ;;  %p4279_p9 = scmp.lt.u32.totalorder %s4271_s25, %s5526_s20 }
 0x8be   : > { %p4273_p4 = pnand %p4272_p3, %p4586_p10 }
 0x8bf   : > { %p4278_p8 = por %p4277_p7, %p4276_p6 }
 0x8c0   : > { %p4274_p5 = pneg %p4273_p4 }
 0x8c1   : > { %p4280_p11 = por %p4279_p9, %p4278_p8 }
 0x8c3   : > { %p4281_p13 = pnand %p4280_p11, %p4274_p5 }
 0x8c5   : > { %4284 = shalt.err (!%p4281_p13)
}
 0x8c6   : > { %s5731_s14 = sld [smem:[#allocation25_spill]]  ;;  %s5732_s22 = sld [smem:[#allocation38_spill]] }
 0x8c7   : > { %3949 = dma.vmem_to_hbm [thread:$0]  (%p4586_p10), %s5529_s12, 128, %s5526_s20, %s2950_s10  }
 0x8c8   : > { %s2969_s25 = sshll.u32 %s4711_s0, 4  ;;  %s5734_s26 = sld [smem:[#allocation40_spill]]  ;;  %s5564_s25 = int_to_ptr.vmem [resolvable:$true] %s2969_s25 }
 0x8c9   : > { %s4285_s20 = scalar_lea.vmem %s5564_s25, 256  ;;  %s4438_s12 = smov [#allocation7]  }
 0x8ca   : > { %p4286_p0 = scmp.ne.s32.totalorder %s5564_s25, %s4285_s20 }
 0x8cc   : > { %s5733_s18 = smov %s5732_s22  ;;  %s5561_s23 = scalar_lea.hbm %s5732_s22, %s3374_s13 }
 0x8cd   : > { %s2945_s2 = scalar_lea.sflag [#allocation8], %s5731_s14  ;;  %p4287_p1 = pnand %p4286_p0, %p4586_p10 }
 0x8ce   : > { %s5735_s16 = smov %s5734_s26  ;;  %s5571_s1 = scalar_lea.hbm %s5734_s26, %s3360_s8 }
 0x8cf   : > { %p4288_p2 = pneg %p4287_p1  ;;  %s4289_s13 = sshll.u32 %s4438_s12, 4  ;;  %s4290_s13 = int_to_ptr.vmem [resolvable:$false] %s4289_s13 }
 0x8d0   : > { %s4291_s0 = scalar_lea.vmem %s4290_s13, 512  ;;  %p4292_p3 = scmp.lt.s32.totalorder %s5564_s25, %s4290_s13 }
 0x8d1   : > { %p4293_p4 = scmp.lt.s32.totalorder %s4291_s0, %s4285_s20 }
 0x8d3   : > { %p4294_p5 = por %p4293_p4, %p4292_p3 }
 0x8d5   : > { %p4295_p6 = pnand %p4294_p5, %p4288_p2 }
 0x8d7   : > { %4298 = shalt.err (!%p4295_p6)
}
 0x8d8   : > { %s4299_s27 = scalar_lea.hbm %s5561_s23, 256  ;;  %s4303_s24 = scalar_lea.hbm %s5733_s18, 512 }
 0x8d9   : > { %p4300_p7 = scmp.ne.s32.totalorder %s5561_s23, %s4299_s27  ;;  %p4304_p11 = scmp.lt.u32.totalorder %s5561_s23, %s5733_s18 }
 0x8da   : > { %p4305_p13 = scmp.lt.u32.totalorder %s4303_s24, %s4299_s27  ;;  %p4307_p1 = scmp.lt.u32.totalorder %s4299_s27, %s5561_s23 }
 0x8db   : > { %p4301_p8 = pnand %p4300_p7, %p4586_p10 }
 0x8dc   : > { %p4306_p0 = por %p4305_p13, %p4304_p11 }
 0x8dd   : > { %p4302_p9 = pneg %p4301_p8 }
 0x8de   : > { %p4308_p2 = por %p4307_p1, %p4306_p0 }
 0x8e0   : > { %p4309_p3 = pnand %p4308_p2, %p4302_p9 }
 0x8e2   : > { %4312 = shalt.err (!%p4309_p3)
}
 0x8e3   : > { %3948 = dma.vmem_to_hbm [thread:$0]  (%p4586_p10), %s5564_s25, 256, %s5561_s23, %s2945_s2  }
 0x8e4   : > { %s2995_s21 = sshll.u32 %s4715_s19, 4  ;;  %s4439_s26 = smov [#allocation11]   ;;  %s2996_s21 = int_to_ptr.vmem [resolvable:$true] %s2995_s21 }
 0x8e5   : > { %s4313_s28 = scalar_lea.vmem %s2996_s21, 128  ;;  %s4317_s20 = sshll.u32 %s4439_s26, 4  ;;  %s4318_s20 = int_to_ptr.vmem [resolvable:$false] %s4317_s20 }
 0x8e6   : > { %p4314_p4 = scmp.ne.s32.totalorder %s2996_s21, %s4313_s28  ;;  %s4319_s12 = scalar_lea.vmem %s4318_s20, 256 }
 0x8e7   : > { %p4320_p7 = scmp.lt.s32.totalorder %s2996_s21, %s4318_s20  ;;  %p4321_p8 = scmp.lt.s32.totalorder %s4319_s12, %s4313_s28 }
 0x8e8   : > { %p4315_p5 = pnand %p4314_p4, %p4586_p10 }
 0x8e9   : > { %p4322_p9 = por %p4321_p8, %p4320_p7 }
 0x8ea   : > { %p4316_p6 = pneg %p4315_p5 }
 0x8ec   : > { %p4323_p11 = pnand %p4322_p9, %p4316_p6 }
 0x8ee   : > { %4326 = shalt.err (!%p4323_p11)
}
 0x8ef   : > { %s4327_s2 = scalar_lea.hbm %s5571_s1, 128  ;;  %s4331_s25 = scalar_lea.hbm %s5735_s16, 256 }
 0x8f0   : > { %p4328_p13 = scmp.ne.s32.totalorder %s5571_s1, %s4327_s2  ;;  %p4332_p2 = scmp.lt.u32.totalorder %s5571_s1, %s5735_s16 }
 0x8f1   : > { %p4333_p3 = scmp.lt.u32.totalorder %s4331_s25, %s4327_s2  ;;  %p4335_p5 = scmp.lt.u32.totalorder %s4327_s2, %s5571_s1 }
 0x8f2   : > { %p4329_p0 = pnand %p4328_p13, %p4586_p10 }
 0x8f3   : > { %p4334_p4 = por %p4333_p3, %p4332_p2 }
 0x8f4   : > { %p4330_p1 = pneg %p4329_p0 }
 0x8f5   : > { %p4336_p6 = por %p4335_p5, %p4334_p4 }
 0x8f7   : > { %p4337_p7 = pnand %p4336_p6, %p4330_p1 }
 0x8f9   : > { %4340 = shalt.err (!%p4337_p7)
}
 0x8fa   : > { %3950 = dma.vmem_to_hbm [thread:$0]  (%p4586_p10), %s2996_s21, 128, %s5571_s1, %s2950_s10  }
 0x8fb PF: > { %s5736_s27 = sld [smem:[#allocation14_spill]]  ;;  %p3964_p8 = scmp.ge.s32.totalorder %s4427_s30, 2 }
 0x8fd   : > { %p3955_p9 = pnand %p3964_p8, %p4595_p12 }
 0x901   : > { %s3007_s14 = sand.u32 1, %s5736_s27  }
 0x902   : > { %s3008_s24 = scalar_lea.sflag [#allocation8], %s3007_s14 }
 0x903   : > { %4382 = dma.done.wait (!%p3955_p9), %s3008_s24, 256  }
 0x904   : > { %4384 = vsyncadd (!%p3955_p9), %s3008_s24, 4294967040  ;;  %s5738_s17 = sadd.s32 4294967294, %s4427_s30  }
 0x905   : > { %s3016_s22 = sand.u32 1, %s5738_s17  }
 0x906   : > { %s3017_s28 = scalar_lea.sflag [#allocation10], %s3016_s22 }
 0x907   : > { %4386 = dma.done.wait (!%p3955_p9), %s3017_s28, 256  }
 0x908   : > { %4388 = vsyncadd (!%p3955_p9), %s3017_s28, 4294967040  ;;  %s29_s30 = sadd.s32 1, %s4427_s30   ;;  %s5739_s21 = sld [smem:[#allocation15_spill]] }
 0x909   : > { %p26_p10 = scmp.ge.s32.totalorder %s29_s30, 6   ;;  %s5740_s22 = sld [smem:[#allocation16_spill]] }
 0x90a   : > { %s5741_s23 = sld [smem:[#allocation23_spill]]  ;;  %s5742_s24 = sld [smem:[#allocation17_spill]] }
 0x90b   : > { %s5743_s25 = sld [smem:[#allocation22_spill]]  ;;  %s5744_s26 = sld [smem:[#allocation18_spill]] }
 0x90c   : > { %s5745_s27 = sld [smem:[#allocation19_spill]]  ;;  %s5746_s28 = sld [smem:[#allocation20_spill]] }
 0x90d   : > { %s5747_s29 = sld [smem:[#allocation21_spill]]  ;;  %28 = sbr.rel (!%p26_p10) target bundleno = 16 (0x10), region = 194 }
 0x914   :  { %3031 = vsyncpa [#allocation8], 1 }
 0x915   :  { %3033 = vsyncpa [#allocation8 + $0x1], 1 }
 0x916   :  { %3034 = vsyncpa [#allocation10], 1 }
 0x917   :  { %3036 = vsyncpa [#allocation10 + $0x1], 1 }

</bundles_post_ra>
